<compile_context>
chip_gen: v6e
topology: v6e:2x2x1
jax: 0.10.0
libtpu: 0.0.40
codegen_flags: <defaults>
</compile_context>

<pallas_src>
import functools

import jax
import jax.numpy as jnp
from jax.experimental import pallas as pl
from jax.experimental.pallas import tpu as pltpu

NEG_SLOPE = 0.01   # torch.nn.LeakyReLU default negative_slope
LANE = 128         # TPU lane width
SUB = 8            # f32 sublane tile


def _leaky(y):
    # negative_slope < 1  =>  LeakyReLU(y) == max(y, a*y)  -> one vmax on the VPU
    return jnp.maximum(y, NEG_SLOPE * y)


def _round_up(n, m):
    return ((n + m - 1) // m) * m


# ----------------------------- fused kernel -------------------------------- #

def _fused_lencoder_kernel(x_ref, w_ref, o_ref, *, layout, n_layers, n_res):
    """layout: tuple of (row_offset, load_rows, cols) static slab coordinates in
    traversal order  sterm(W,b) -> [layer(W,b), (rb W1,b1,W2,b2)*n_res]*n_layers
    -> final(W,b).  All offsets are (8,128)-tile aligned, so slices are views."""
    it = iter(layout)

    def _next_slice():
        r0, nr, nc = next(it)
        return w_ref[r0:r0 + nr, 0:nc]          # static, tile-aligned slice

    def linear(h):
        w = _next_slice()                        # (in_p, out_p) weight block
        b = _next_slice()                        # (1, out_p)    bias row
        return jnp.dot(h, w, preferred_element_type=jnp.float32) + b

    h = x_ref[...].astype(jnp.float32)

    h = linear(h)                                # sterm: Linear, no activation
    for _ in range(n_layers):                    # statically unrolled
        h = _leaky(linear(h))                    # Linear + LeakyReLU (+ Dropout = id)
        for _ in range(n_res):
            r = _leaky(linear(h))                # ResidualBlock:
            r = linear(r)                        #   LeakyReLU(L2(LeakyReLU(L1(x)))) + x
            h = _leaky(r) + h
    z = linear(h)                                # final projection
    o_ref[...] = z.astype(o_ref.dtype)


# -------------------------- parameter building ----------------------------- #

def _init_linear(key, fan_in, fan_out):
    # PyTorch nn.Linear default init: U(-1/sqrt(fan_in), 1/sqrt(fan_in))
    kw, kb = jax.random.split(key)
    bound = 1.0 / float(fan_in) ** 0.5
    w = jax.random.uniform(kw, (fan_in, fan_out), jnp.float32, -bound, bound)
    b = jax.random.uniform(kb, (1, fan_out), jnp.float32, -bound, bound)
    return w, b


def init_lencoder_params(key, in_dim, z_features, fdim=1024, mult=(1, 1, 1, 1),
                         num_residual_blocks=2, double_z=True):
    if double_z:
        z_features = z_features * 2
    dims = [fdim]
    cur = fdim
    for m in mult:
        cur = cur // 2
        dims.append(cur * m)

    params = {"dims": dims, "z_features": z_features,
              "num_residual_blocks": num_residual_blocks}
    key, k = jax.random.split(key)
    params["sterm"] = _init_linear(k, in_dim, fdim)

    layers, resblocks = [], []
    for i in range(len(dims) - 1):
        key, k = jax.random.split(key)
        layers.append(_init_linear(k, dims[i], dims[i + 1]))
        rbs = []
        for _ in range(num_residual_blocks):
            key, k1 = jax.random.split(key)
            key, k2 = jax.random.split(key)
            rbs.append((_init_linear(k1, dims[i + 1], dims[i + 1]),
                        _init_linear(k2, dims[i + 1], dims[i + 1])))
        resblocks.append(rbs)

    key, k = jax.random.split(key)
    params["final"] = _init_linear(k, dims[-1], z_features)
    params["layers"] = layers
    params["resblocks"] = resblocks
    return params


# ------------------------------ packing ------------------------------------ #

def prepare_lencoder(params, in_dim):
    """One-time prep: pack every weight/bias into ONE f32 slab with
    (8,128)-aligned sub-blocks, zero-padding every feature dim below 128 up to
    128 so the whole chain is lane-dense.  Padded weight rows/cols and bias
    entries are exactly zero, so padding cannot leak through LeakyReLU or the
    residual adds."""
    dims = params["dims"]
    zf = params["z_features"]

    in_p = _round_up(in_dim, SUB)                       # x-column / sterm-row pad
    pdims = [_round_up(d, LANE) for d in dims]
    zf_p = _round_up(zf, LANE)
    slab_w = max(pdims + [zf_p])

    blocks, layout = [], []
    row = 0
    flops_per_row = 0

    def _add(arr, pad_rows, cols, load_rows):
        nonlocal row
        r, c = arr.shape
        blk = jnp.zeros((pad_rows, slab_w), jnp.float32)
        blk = blk.at[:r, :c].set(arr.astype(jnp.float32))
        blocks.append(blk)
        layout.append((row, load_rows, cols))
        row += pad_rows

    def _add_linear(w, b, pad_in, pad_out):
        nonlocal flops_per_row
        _add(w, pad_in, pad_out, pad_in)                # weight block
        _add(b, SUB, pad_out, 1)                        # bias: 8 rows reserved, 1 loaded
        flops_per_row += 2 * pad_in * pad_out

    sw, sb = params["sterm"]
    _add_linear(sw, sb, in_p, pdims[0])
    for i, ((lw, lb), rbs) in enumerate(zip(params["layers"], params["resblocks"])):
        _add_linear(lw, lb, pdims[i], pdims[i + 1])
        for (w1, b1), (w2, b2) in rbs:
            _add_linear(w1, b1, pdims[i + 1], pdims[i + 1])
            _add_linear(w2, b2, pdims[i + 1], pdims[i + 1])
    fw, fb = params["final"]
    _add_linear(fw, fb, pdims[-1], zf_p)

    slab = jnp.concatenate(blocks, axis=0)
    return {
        "slab": slab, "layout": tuple(layout),
        "in_dim": in_dim, "in_p": in_p,
        "zf": zf, "zf_p": zf_p,
        "n_layers": len(params["layers"]),
        "n_res": params["num_residual_blocks"],
        "flops_per_row": flops_per_row,
    }


# ------------------------------ forward ------------------------------------ #

def lencoder_forward(packed, x, *, in_channels):
    B = x.shape[0]
    # x.view(-1, my_channels, in_dim) + Linear over the last dim is a row-wise
    # matmul on (N, in_dim) rows; the later view(B, in_channels, fdim) is a
    # reshape of the same elements.
    rows = x.reshape(-1, packed["in_dim"])
    if packed["in_p"] != packed["in_dim"]:
        rows = jnp.pad(rows, ((0, 0), (0, packed["in_p"] - packed["in_dim"])))
    N = rows.shape[0]
    slab = packed["slab"]

    kernel = functools.partial(
        _fused_lencoder_kernel,
        layout=packed["layout"],
        n_layers=packed["n_layers"],
        n_res=packed["n_res"],
    )
    cost = pl.CostEstimate(
        flops=N * packed["flops_per_row"],
        transcendentals=0,
        bytes_accessed=rows.size * 4 + slab.size * 4 + N * packed["zf_p"] * 4,
    )

    vmem = pl.BlockSpec(memory_space=pltpu.MemorySpace.VMEM)
    # Gridless: N is tiny; for large N on v7x a leading "parallel" row-grid axis
    # would feed both TensorCores, but at N=32 it only adds per-step overhead.
    z_pad = pl.pallas_call(
        kernel,
        out_shape=jax.ShapeDtypeStruct((N, packed["zf_p"]), x.dtype),
        in_specs=[vmem, vmem],
        out_specs=vmem,
        cost_estimate=cost,
    )(rows, slab)

    # Slice off the lane padding in the wrapper (cheap XLA slice) and restore shape.
    return z_pad[:, :packed["zf"]].reshape(B, in_channels, packed["zf"])


# --------------------------- pure-JAX reference ----------------------------- #

def _ref_forward(params, x, *, in_dim, in_channels):
    B = x.shape[0]
    hp = jax.lax.Precision.HIGHEST
    h = x.reshape(-1, in_dim)
    sw, sb = params["sterm"]
    h = jnp.dot(h, sw, precision=hp) + sb
    for (w, b), rbs in zip(params["layers"], params["resblocks"]):
        h = jnp.where(h_ := jnp.dot(h, w, precision=hp) + b, h_, h_)  # placeholder no-op
        h = jnp.maximum(h_, NEG_SLOPE * h_)
        for (w1, b1), (w2, b2) in rbs:
            r = jnp.dot(h, w1, precision=hp) + b1
            r = jnp.maximum(r, NEG_SLOPE * r)
            r = jnp.dot(r, w2, precision=hp) + b2
            h = jnp.maximum(r, NEG_SLOPE * r) + h
    fw, fb = params["final"]
    z = jnp.dot(h, fw, precision=hp) + fb
    return z.reshape(B, in_channels, params["z_features"])


# ------------------------------- main --------------------------------------- #

if __name__ == "__main__":
    # small but shape-consistent config
    B, in_channels, my_channels = 2, 16, 1
    in_dim, fdim, z_features = 32, 256, 8     # dims: 256->128->64->32->16, z=16 (double_z)

    key = jax.random.PRNGKey(0)
    kx, kp = jax.random.split(key)
    x = jax.random.normal(kx, (B, in_channels, in_dim), dtype=jnp.float32)
    params = init_lencoder_params(kp, in_dim, z_features, fdim=fdim,
                                  mult=(1, 1, 1, 1), num_residual_blocks=2,
                                  double_z=True)

    packed = prepare_lencoder(params, in_dim)           # one-time slab packing
    z = lencoder_forward(packed, x, in_channels=in_channels)
    jax.block_until_ready(z)

    assert z.shape == (B, in_channels, 2 * z_features), z.shape
    assert z.dtype == jnp.float32

    z_ref = _ref_forward(params, x, in_dim=in_dim, in_channels=in_channels)
    assert jnp.allclose(z, z_ref, rtol=5e-3, atol=5e-3), \
        float(jnp.max(jnp.abs(z - z_ref)))

    # TODO(synk): nn.Dropout train-mode masking not implemented (eval-mode identity).
    print("KERNEL_OK")
</pallas_src>

<mosaic_0001>
module attributes {stable_mosaic.version = 11 : i64} {
  func.func @_fused_lencoder_kernel(%arg0: memref<32x32xf32, #tpu.memory_space<vmem>>, %arg1: memref<3024x256xf32, #tpu.memory_space<vmem>>, %arg2: memref<32x128xf32, #tpu.memory_space<vmem>>) attributes {dimension_semantics = [], scalar_prefetch = 0 : i64, scratch_operands = 0 : i64, tpu.core_type = #tpu.core_type<tc>} {
    %c0 = arith.constant 0 : index
    %c0_0 = arith.constant 0 : index
    %0 = vector.load %arg0[%c0, %c0_0] : memref<32x32xf32, #tpu.memory_space<vmem>>, vector<32x32xf32>
    %c0_1 = arith.constant 0 : index
    %c0_2 = arith.constant 0 : index
    %1 = vector.load %arg1[%c0_1, %c0_2] : memref<3024x256xf32, #tpu.memory_space<vmem>>, vector<32x256xf32>
    %c32 = arith.constant 32 : index
    %c0_3 = arith.constant 0 : index
    %2 = vector.load %arg1[%c32, %c0_3] : memref<3024x256xf32, #tpu.memory_space<vmem>>, vector<1x256xf32>
    %cst = arith.constant dense<0.000000e+00> : vector<32x256xf32>
    %3 = tpu.matmul %0, %1, %cst {dimension_numbers = #tpu.dot_dimension_numbers<[1], [0], [0], [1], [0, 0, 1, 1], [], []>} : vector<32x32xf32>, vector<32x256xf32>, vector<32x256xf32> -> vector<32x256xf32>
    %4 = vector.broadcast %2 : vector<1x256xf32> to vector<32x256xf32>
    %5 = arith.addf %3, %4 : vector<32x256xf32>
    %c40 = arith.constant 40 : index
    %c0_4 = arith.constant 0 : index
    %6 = vector.load %arg1[%c40, %c0_4] : memref<3024x256xf32, #tpu.memory_space<vmem>>, vector<256x128xf32>
    %c296 = arith.constant 296 : index
    %c0_5 = arith.constant 0 : index
    %7 = vector.load %arg1[%c296, %c0_5] : memref<3024x256xf32, #tpu.memory_space<vmem>>, vector<1x128xf32>
    %cst_6 = arith.constant dense<0.000000e+00> : vector<32x128xf32>
    %8 = tpu.matmul %5, %6, %cst_6 {dimension_numbers = #tpu.dot_dimension_numbers<[1], [0], [0], [1], [0, 0, 1, 1], [], []>} : vector<32x256xf32>, vector<256x128xf32>, vector<32x128xf32> -> vector<32x128xf32>
    %9 = vector.broadcast %7 : vector<1x128xf32> to vector<32x128xf32>
    %10 = arith.addf %8, %9 : vector<32x128xf32>
    %cst_7 = arith.constant 0.00999999977 : f32
    %11 = vector.broadcast %cst_7 : f32 to vector<32x128xf32>
    %12 = arith.mulf %11, %10 : vector<32x128xf32>
    %13 = arith.maximumf %10, %12 : vector<32x128xf32>
    %c304 = arith.constant 304 : index
    %c0_8 = arith.constant 0 : index
    %14 = vector.load %arg1[%c304, %c0_8] : memref<3024x256xf32, #tpu.memory_space<vmem>>, vector<128x128xf32>
    %c432 = arith.constant 432 : index
    %c0_9 = arith.constant 0 : index
    %15 = vector.load %arg1[%c432, %c0_9] : memref<3024x256xf32, #tpu.memory_space<vmem>>, vector<1x128xf32>
    %cst_10 = arith.constant dense<0.000000e+00> : vector<32x128xf32>
    %16 = tpu.matmul %13, %14, %cst_10 {dimension_numbers = #tpu.dot_dimension_numbers<[1], [0], [0], [1], [0, 0, 1, 1], [], []>} : vector<32x128xf32>, vector<128x128xf32>, vector<32x128xf32> -> vector<32x128xf32>
    %17 = vector.broadcast %15 : vector<1x128xf32> to vector<32x128xf32>
    %18 = arith.addf %16, %17 : vector<32x128xf32>
    %cst_11 = arith.constant 0.00999999977 : f32
    %19 = vector.broadcast %cst_11 : f32 to vector<32x128xf32>
    %20 = arith.mulf %19, %18 : vector<32x128xf32>
    %21 = arith.maximumf %18, %20 : vector<32x128xf32>
    %c440 = arith.constant 440 : index
    %c0_12 = arith.constant 0 : index
    %22 = vector.load %arg1[%c440, %c0_12] : memref<3024x256xf32, #tpu.memory_space<vmem>>, vector<128x128xf32>
    %c568 = arith.constant 568 : index
    %c0_13 = arith.constant 0 : index
    %23 = vector.load %arg1[%c568, %c0_13] : memref<3024x256xf32, #tpu.memory_space<vmem>>, vector<1x128xf32>
    %cst_14 = arith.constant dense<0.000000e+00> : vector<32x128xf32>
    %24 = tpu.matmul %21, %22, %cst_14 {dimension_numbers = #tpu.dot_dimension_numbers<[1], [0], [0], [1], [0, 0, 1, 1], [], []>} : vector<32x128xf32>, vector<128x128xf32>, vector<32x128xf32> -> vector<32x128xf32>
    %25 = vector.broadcast %23 : vector<1x128xf32> to vector<32x128xf32>
    %26 = arith.addf %24, %25 : vector<32x128xf32>
    %cst_15 = arith.constant 0.00999999977 : f32
    %27 = vector.broadcast %cst_15 : f32 to vector<32x128xf32>
    %28 = arith.mulf %27, %26 : vector<32x128xf32>
    %29 = arith.maximumf %26, %28 : vector<32x128xf32>
    %30 = arith.addf %29, %13 : vector<32x128xf32>
    %c576 = arith.constant 576 : index
    %c0_16 = arith.constant 0 : index
    %31 = vector.load %arg1[%c576, %c0_16] : memref<3024x256xf32, #tpu.memory_space<vmem>>, vector<128x128xf32>
    %c704 = arith.constant 704 : index
    %c0_17 = arith.constant 0 : index
    %32 = vector.load %arg1[%c704, %c0_17] : memref<3024x256xf32, #tpu.memory_space<vmem>>, vector<1x128xf32>
    %cst_18 = arith.constant dense<0.000000e+00> : vector<32x128xf32>
    %33 = tpu.matmul %30, %31, %cst_18 {dimension_numbers = #tpu.dot_dimension_numbers<[1], [0], [0], [1], [0, 0, 1, 1], [], []>} : vector<32x128xf32>, vector<128x128xf32>, vector<32x128xf32> -> vector<32x128xf32>
    %34 = vector.broadcast %32 : vector<1x128xf32> to vector<32x128xf32>
    %35 = arith.addf %33, %34 : vector<32x128xf32>
    %cst_19 = arith.constant 0.00999999977 : f32
    %36 = vector.broadcast %cst_19 : f32 to vector<32x128xf32>
    %37 = arith.mulf %36, %35 : vector<32x128xf32>
    %38 = arith.maximumf %35, %37 : vector<32x128xf32>
    %c712 = arith.constant 712 : index
    %c0_20 = arith.constant 0 : index
    %39 = vector.load %arg1[%c712, %c0_20] : memref<3024x256xf32, #tpu.memory_space<vmem>>, vector<128x128xf32>
    %c840 = arith.constant 840 : index
    %c0_21 = arith.constant 0 : index
    %40 = vector.load %arg1[%c840, %c0_21] : memref<3024x256xf32, #tpu.memory_space<vmem>>, vector<1x128xf32>
    %cst_22 = arith.constant dense<0.000000e+00> : vector<32x128xf32>
    %41 = tpu.matmul %38, %39, %cst_22 {dimension_numbers = #tpu.dot_dimension_numbers<[1], [0], [0], [1], [0, 0, 1, 1], [], []>} : vector<32x128xf32>, vector<128x128xf32>, vector<32x128xf32> -> vector<32x128xf32>
    %42 = vector.broadcast %40 : vector<1x128xf32> to vector<32x128xf32>
    %43 = arith.addf %41, %42 : vector<32x128xf32>
    %cst_23 = arith.constant 0.00999999977 : f32
    %44 = vector.broadcast %cst_23 : f32 to vector<32x128xf32>
    %45 = arith.mulf %44, %43 : vector<32x128xf32>
    %46 = arith.maximumf %43, %45 : vector<32x128xf32>
    %47 = arith.addf %46, %30 : vector<32x128xf32>
    %c848 = arith.constant 848 : index
    %c0_24 = arith.constant 0 : index
    %48 = vector.load %arg1[%c848, %c0_24] : memref<3024x256xf32, #tpu.memory_space<vmem>>, vector<128x128xf32>
    %c976 = arith.constant 976 : index
    %c0_25 = arith.constant 0 : index
    %49 = vector.load %arg1[%c976, %c0_25] : memref<3024x256xf32, #tpu.memory_space<vmem>>, vector<1x128xf32>
    %cst_26 = arith.constant dense<0.000000e+00> : vector<32x128xf32>
    %50 = tpu.matmul %47, %48, %cst_26 {dimension_numbers = #tpu.dot_dimension_numbers<[1], [0], [0], [1], [0, 0, 1, 1], [], []>} : vector<32x128xf32>, vector<128x128xf32>, vector<32x128xf32> -> vector<32x128xf32>
    %51 = vector.broadcast %49 : vector<1x128xf32> to vector<32x128xf32>
    %52 = arith.addf %50, %51 : vector<32x128xf32>
    %cst_27 = arith.constant 0.00999999977 : f32
    %53 = vector.broadcast %cst_27 : f32 to vector<32x128xf32>
    %54 = arith.mulf %53, %52 : vector<32x128xf32>
    %55 = arith.maximumf %52, %54 : vector<32x128xf32>
    %c984 = arith.constant 984 : index
    %c0_28 = arith.constant 0 : index
    %56 = vector.load %arg1[%c984, %c0_28] : memref<3024x256xf32, #tpu.memory_space<vmem>>, vector<128x128xf32>
    %c1112 = arith.constant 1112 : index
    %c0_29 = arith.constant 0 : index
    %57 = vector.load %arg1[%c1112, %c0_29] : memref<3024x256xf32, #tpu.memory_space<vmem>>, vector<1x128xf32>
    %cst_30 = arith.constant dense<0.000000e+00> : vector<32x128xf32>
    %58 = tpu.matmul %55, %56, %cst_30 {dimension_numbers = #tpu.dot_dimension_numbers<[1], [0], [0], [1], [0, 0, 1, 1], [], []>} : vector<32x128xf32>, vector<128x128xf32>, vector<32x128xf32> -> vector<32x128xf32>
    %59 = vector.broadcast %57 : vector<1x128xf32> to vector<32x128xf32>
    %60 = arith.addf %58, %59 : vector<32x128xf32>
    %cst_31 = arith.constant 0.00999999977 : f32
    %61 = vector.broadcast %cst_31 : f32 to vector<32x128xf32>
    %62 = arith.mulf %61, %60 : vector<32x128xf32>
    %63 = arith.maximumf %60, %62 : vector<32x128xf32>
    %c1120 = arith.constant 1120 : index
    %c0_32 = arith.constant 0 : index
    %64 = vector.load %arg1[%c1120, %c0_32] : memref<3024x256xf32, #tpu.memory_space<vmem>>, vector<128x128xf32>
    %c1248 = arith.constant 1248 : index
    %c0_33 = arith.constant 0 : index
    %65 = vector.load %arg1[%c1248, %c0_33] : memref<3024x256xf32, #tpu.memory_space<vmem>>, vector<1x128xf32>
    %cst_34 = arith.constant dense<0.000000e+00> : vector<32x128xf32>
    %66 = tpu.matmul %63, %64, %cst_34 {dimension_numbers = #tpu.dot_dimension_numbers<[1], [0], [0], [1], [0, 0, 1, 1], [], []>} : vector<32x128xf32>, vector<128x128xf32>, vector<32x128xf32> -> vector<32x128xf32>
    %67 = vector.broadcast %65 : vector<1x128xf32> to vector<32x128xf32>
    %68 = arith.addf %66, %67 : vector<32x128xf32>
    %cst_35 = arith.constant 0.00999999977 : f32
    %69 = vector.broadcast %cst_35 : f32 to vector<32x128xf32>
    %70 = arith.mulf %69, %68 : vector<32x128xf32>
    %71 = arith.maximumf %68, %70 : vector<32x128xf32>
    %72 = arith.addf %71, %55 : vector<32x128xf32>
    %c1256 = arith.constant 1256 : index
    %c0_36 = arith.constant 0 : index
    %73 = vector.load %arg1[%c1256, %c0_36] : memref<3024x256xf32, #tpu.memory_space<vmem>>, vector<128x128xf32>
    %c1384 = arith.constant 1384 : index
    %c0_37 = arith.constant 0 : index
    %74 = vector.load %arg1[%c1384, %c0_37] : memref<3024x256xf32, #tpu.memory_space<vmem>>, vector<1x128xf32>
    %cst_38 = arith.constant dense<0.000000e+00> : vector<32x128xf32>
    %75 = tpu.matmul %72, %73, %cst_38 {dimension_numbers = #tpu.dot_dimension_numbers<[1], [0], [0], [1], [0, 0, 1, 1], [], []>} : vector<32x128xf32>, vector<128x128xf32>, vector<32x128xf32> -> vector<32x128xf32>
    %76 = vector.broadcast %74 : vector<1x128xf32> to vector<32x128xf32>
    %77 = arith.addf %75, %76 : vector<32x128xf32>
    %cst_39 = arith.constant 0.00999999977 : f32
    %78 = vector.broadcast %cst_39 : f32 to vector<32x128xf32>
    %79 = arith.mulf %78, %77 : vector<32x128xf32>
    %80 = arith.maximumf %77, %79 : vector<32x128xf32>
    %c1392 = arith.constant 1392 : index
    %c0_40 = arith.constant 0 : index
    %81 = vector.load %arg1[%c1392, %c0_40] : memref<3024x256xf32, #tpu.memory_space<vmem>>, vector<128x128xf32>
    %c1520 = arith.constant 1520 : index
    %c0_41 = arith.constant 0 : index
    %82 = vector.load %arg1[%c1520, %c0_41] : memref<3024x256xf32, #tpu.memory_space<vmem>>, vector<1x128xf32>
    %cst_42 = arith.constant dense<0.000000e+00> : vector<32x128xf32>
    %83 = tpu.matmul %80, %81, %cst_42 {dimension_numbers = #tpu.dot_dimension_numbers<[1], [0], [0], [1], [0, 0, 1, 1], [], []>} : vector<32x128xf32>, vector<128x128xf32>, vector<32x128xf32> -> vector<32x128xf32>
    %84 = vector.broadcast %82 : vector<1x128xf32> to vector<32x128xf32>
    %85 = arith.addf %83, %84 : vector<32x128xf32>
    %cst_43 = arith.constant 0.00999999977 : f32
    %86 = vector.broadcast %cst_43 : f32 to vector<32x128xf32>
    %87 = arith.mulf %86, %85 : vector<32x128xf32>
    %88 = arith.maximumf %85, %87 : vector<32x128xf32>
    %89 = arith.addf %88, %72 : vector<32x128xf32>
    %c1528 = arith.constant 1528 : index
    %c0_44 = arith.constant 0 : index
    %90 = vector.load %arg1[%c1528, %c0_44] : memref<3024x256xf32, #tpu.memory_space<vmem>>, vector<128x128xf32>
    %c1656 = arith.constant 1656 : index
    %c0_45 = arith.constant 0 : index
    %91 = vector.load %arg1[%c1656, %c0_45] : memref<3024x256xf32, #tpu.memory_space<vmem>>, vector<1x128xf32>
    %cst_46 = arith.constant dense<0.000000e+00> : vector<32x128xf32>
    %92 = tpu.matmul %89, %90, %cst_46 {dimension_numbers = #tpu.dot_dimension_numbers<[1], [0], [0], [1], [0, 0, 1, 1], [], []>} : vector<32x128xf32>, vector<128x128xf32>, vector<32x128xf32> -> vector<32x128xf32>
    %93 = vector.broadcast %91 : vector<1x128xf32> to vector<32x128xf32>
    %94 = arith.addf %92, %93 : vector<32x128xf32>
    %cst_47 = arith.constant 0.00999999977 : f32
    %95 = vector.broadcast %cst_47 : f32 to vector<32x128xf32>
    %96 = arith.mulf %95, %94 : vector<32x128xf32>
    %97 = arith.maximumf %94, %96 : vector<32x128xf32>
    %c1664 = arith.constant 1664 : index
    %c0_48 = arith.constant 0 : index
    %98 = vector.load %arg1[%c1664, %c0_48] : memref<3024x256xf32, #tpu.memory_space<vmem>>, vector<128x128xf32>
    %c1792 = arith.constant 1792 : index
    %c0_49 = arith.constant 0 : index
    %99 = vector.load %arg1[%c1792, %c0_49] : memref<3024x256xf32, #tpu.memory_space<vmem>>, vector<1x128xf32>
    %cst_50 = arith.constant dense<0.000000e+00> : vector<32x128xf32>
    %100 = tpu.matmul %97, %98, %cst_50 {dimension_numbers = #tpu.dot_dimension_numbers<[1], [0], [0], [1], [0, 0, 1, 1], [], []>} : vector<32x128xf32>, vector<128x128xf32>, vector<32x128xf32> -> vector<32x128xf32>
    %101 = vector.broadcast %99 : vector<1x128xf32> to vector<32x128xf32>
    %102 = arith.addf %100, %101 : vector<32x128xf32>
    %cst_51 = arith.constant 0.00999999977 : f32
    %103 = vector.broadcast %cst_51 : f32 to vector<32x128xf32>
    %104 = arith.mulf %103, %102 : vector<32x128xf32>
    %105 = arith.maximumf %102, %104 : vector<32x128xf32>
    %c1800 = arith.constant 1800 : index
    %c0_52 = arith.constant 0 : index
    %106 = vector.load %arg1[%c1800, %c0_52] : memref<3024x256xf32, #tpu.memory_space<vmem>>, vector<128x128xf32>
    %c1928 = arith.constant 1928 : index
    %c0_53 = arith.constant 0 : index
    %107 = vector.load %arg1[%c1928, %c0_53] : memref<3024x256xf32, #tpu.memory_space<vmem>>, vector<1x128xf32>
    %cst_54 = arith.constant dense<0.000000e+00> : vector<32x128xf32>
    %108 = tpu.matmul %105, %106, %cst_54 {dimension_numbers = #tpu.dot_dimension_numbers<[1], [0], [0], [1], [0, 0, 1, 1], [], []>} : vector<32x128xf32>, vector<128x128xf32>, vector<32x128xf32> -> vector<32x128xf32>
    %109 = vector.broadcast %107 : vector<1x128xf32> to vector<32x128xf32>
    %110 = arith.addf %108, %109 : vector<32x128xf32>
    %cst_55 = arith.constant 0.00999999977 : f32
    %111 = vector.broadcast %cst_55 : f32 to vector<32x128xf32>
    %112 = arith.mulf %111, %110 : vector<32x128xf32>
    %113 = arith.maximumf %110, %112 : vector<32x128xf32>
    %114 = arith.addf %113, %97 : vector<32x128xf32>
    %c1936 = arith.constant 1936 : index
    %c0_56 = arith.constant 0 : index
    %115 = vector.load %arg1[%c1936, %c0_56] : memref<3024x256xf32, #tpu.memory_space<vmem>>, vector<128x128xf32>
    %c2064 = arith.constant 2064 : index
    %c0_57 = arith.constant 0 : index
    %116 = vector.load %arg1[%c2064, %c0_57] : memref<3024x256xf32, #tpu.memory_space<vmem>>, vector<1x128xf32>
    %cst_58 = arith.constant dense<0.000000e+00> : vector<32x128xf32>
    %117 = tpu.matmul %114, %115, %cst_58 {dimension_numbers = #tpu.dot_dimension_numbers<[1], [0], [0], [1], [0, 0, 1, 1], [], []>} : vector<32x128xf32>, vector<128x128xf32>, vector<32x128xf32> -> vector<32x128xf32>
    %118 = vector.broadcast %116 : vector<1x128xf32> to vector<32x128xf32>
    %119 = arith.addf %117, %118 : vector<32x128xf32>
    %cst_59 = arith.constant 0.00999999977 : f32
    %120 = vector.broadcast %cst_59 : f32 to vector<32x128xf32>
    %121 = arith.mulf %120, %119 : vector<32x128xf32>
    %122 = arith.maximumf %119, %121 : vector<32x128xf32>
    %c2072 = arith.constant 2072 : index
    %c0_60 = arith.constant 0 : index
    %123 = vector.load %arg1[%c2072, %c0_60] : memref<3024x256xf32, #tpu.memory_space<vmem>>, vector<128x128xf32>
    %c2200 = arith.constant 2200 : index
    %c0_61 = arith.constant 0 : index
    %124 = vector.load %arg1[%c2200, %c0_61] : memref<3024x256xf32, #tpu.memory_space<vmem>>, vector<1x128xf32>
    %cst_62 = arith.constant dense<0.000000e+00> : vector<32x128xf32>
    %125 = tpu.matmul %122, %123, %cst_62 {dimension_numbers = #tpu.dot_dimension_numbers<[1], [0], [0], [1], [0, 0, 1, 1], [], []>} : vector<32x128xf32>, vector<128x128xf32>, vector<32x128xf32> -> vector<32x128xf32>
    %126 = vector.broadcast %124 : vector<1x128xf32> to vector<32x128xf32>
    %127 = arith.addf %125, %126 : vector<32x128xf32>
    %cst_63 = arith.constant 0.00999999977 : f32
    %128 = vector.broadcast %cst_63 : f32 to vector<32x128xf32>
    %129 = arith.mulf %128, %127 : vector<32x128xf32>
    %130 = arith.maximumf %127, %129 : vector<32x128xf32>
    %131 = arith.addf %130, %114 : vector<32x128xf32>
    %c2208 = arith.constant 2208 : index
    %c0_64 = arith.constant 0 : index
    %132 = vector.load %arg1[%c2208, %c0_64] : memref<3024x256xf32, #tpu.memory_space<vmem>>, vector<128x128xf32>
    %c2336 = arith.constant 2336 : index
    %c0_65 = arith.constant 0 : index
    %133 = vector.load %arg1[%c2336, %c0_65] : memref<3024x256xf32, #tpu.memory_space<vmem>>, vector<1x128xf32>
    %cst_66 = arith.constant dense<0.000000e+00> : vector<32x128xf32>
    %134 = tpu.matmul %131, %132, %cst_66 {dimension_numbers = #tpu.dot_dimension_numbers<[1], [0], [0], [1], [0, 0, 1, 1], [], []>} : vector<32x128xf32>, vector<128x128xf32>, vector<32x128xf32> -> vector<32x128xf32>
    %135 = vector.broadcast %133 : vector<1x128xf32> to vector<32x128xf32>
    %136 = arith.addf %134, %135 : vector<32x128xf32>
    %cst_67 = arith.constant 0.00999999977 : f32
    %137 = vector.broadcast %cst_67 : f32 to vector<32x128xf32>
    %138 = arith.mulf %137, %136 : vector<32x128xf32>
    %139 = arith.maximumf %136, %138 : vector<32x128xf32>
    %c2344 = arith.constant 2344 : index
    %c0_68 = arith.constant 0 : index
    %140 = vector.load %arg1[%c2344, %c0_68] : memref<3024x256xf32, #tpu.memory_space<vmem>>, vector<128x128xf32>
    %c2472 = arith.constant 2472 : index
    %c0_69 = arith.constant 0 : index
    %141 = vector.load %arg1[%c2472, %c0_69] : memref<3024x256xf32, #tpu.memory_space<vmem>>, vector<1x128xf32>
    %cst_70 = arith.constant dense<0.000000e+00> : vector<32x128xf32>
    %142 = tpu.matmul %139, %140, %cst_70 {dimension_numbers = #tpu.dot_dimension_numbers<[1], [0], [0], [1], [0, 0, 1, 1], [], []>} : vector<32x128xf32>, vector<128x128xf32>, vector<32x128xf32> -> vector<32x128xf32>
    %143 = vector.broadcast %141 : vector<1x128xf32> to vector<32x128xf32>
    %144 = arith.addf %142, %143 : vector<32x128xf32>
    %cst_71 = arith.constant 0.00999999977 : f32
    %145 = vector.broadcast %cst_71 : f32 to vector<32x128xf32>
    %146 = arith.mulf %145, %144 : vector<32x128xf32>
    %147 = arith.maximumf %144, %146 : vector<32x128xf32>
    %c2480 = arith.constant 2480 : index
    %c0_72 = arith.constant 0 : index
    %148 = vector.load %arg1[%c2480, %c0_72] : memref<3024x256xf32, #tpu.memory_space<vmem>>, vector<128x128xf32>
    %c2608 = arith.constant 2608 : index
    %c0_73 = arith.constant 0 : index
    %149 = vector.load %arg1[%c2608, %c0_73] : memref<3024x256xf32, #tpu.memory_space<vmem>>, vector<1x128xf32>
    %cst_74 = arith.constant dense<0.000000e+00> : vector<32x128xf32>
    %150 = tpu.matmul %147, %148, %cst_74 {dimension_numbers = #tpu.dot_dimension_numbers<[1], [0], [0], [1], [0, 0, 1, 1], [], []>} : vector<32x128xf32>, vector<128x128xf32>, vector<32x128xf32> -> vector<32x128xf32>
    %151 = vector.broadcast %149 : vector<1x128xf32> to vector<32x128xf32>
    %152 = arith.addf %150, %151 : vector<32x128xf32>
    %cst_75 = arith.constant 0.00999999977 : f32
    %153 = vector.broadcast %cst_75 : f32 to vector<32x128xf32>
    %154 = arith.mulf %153, %152 : vector<32x128xf32>
    %155 = arith.maximumf %152, %154 : vector<32x128xf32>
    %156 = arith.addf %155, %139 : vector<32x128xf32>
    %c2616 = arith.constant 2616 : index
    %c0_76 = arith.constant 0 : index
    %157 = vector.load %arg1[%c2616, %c0_76] : memref<3024x256xf32, #tpu.memory_space<vmem>>, vector<128x128xf32>
    %c2744 = arith.constant 2744 : index
    %c0_77 = arith.constant 0 : index
    %158 = vector.load %arg1[%c2744, %c0_77] : memref<3024x256xf32, #tpu.memory_space<vmem>>, vector<1x128xf32>
    %cst_78 = arith.constant dense<0.000000e+00> : vector<32x128xf32>
    %159 = tpu.matmul %156, %157, %cst_78 {dimension_numbers = #tpu.dot_dimension_numbers<[1], [0], [0], [1], [0, 0, 1, 1], [], []>} : vector<32x128xf32>, vector<128x128xf32>, vector<32x128xf32> -> vector<32x128xf32>
    %160 = vector.broadcast %158 : vector<1x128xf32> to vector<32x128xf32>
    %161 = arith.addf %159, %160 : vector<32x128xf32>
    %cst_79 = arith.constant 0.00999999977 : f32
    %162 = vector.broadcast %cst_79 : f32 to vector<32x128xf32>
    %163 = arith.mulf %162, %161 : vector<32x128xf32>
    %164 = arith.maximumf %161, %163 : vector<32x128xf32>
    %c2752 = arith.constant 2752 : index
    %c0_80 = arith.constant 0 : index
    %165 = vector.load %arg1[%c2752, %c0_80] : memref<3024x256xf32, #tpu.memory_space<vmem>>, vector<128x128xf32>
    %c2880 = arith.constant 2880 : index
    %c0_81 = arith.constant 0 : index
    %166 = vector.load %arg1[%c2880, %c0_81] : memref<3024x256xf32, #tpu.memory_space<vmem>>, vector<1x128xf32>
    %cst_82 = arith.constant dense<0.000000e+00> : vector<32x128xf32>
    %167 = tpu.matmul %164, %165, %cst_82 {dimension_numbers = #tpu.dot_dimension_numbers<[1], [0], [0], [1], [0, 0, 1, 1], [], []>} : vector<32x128xf32>, vector<128x128xf32>, vector<32x128xf32> -> vector<32x128xf32>
    %168 = vector.broadcast %166 : vector<1x128xf32> to vector<32x128xf32>
    %169 = arith.addf %167, %168 : vector<32x128xf32>
    %cst_83 = arith.constant 0.00999999977 : f32
    %170 = vector.broadcast %cst_83 : f32 to vector<32x128xf32>
    %171 = arith.mulf %170, %169 : vector<32x128xf32>
    %172 = arith.maximumf %169, %171 : vector<32x128xf32>
    %173 = arith.addf %172, %156 : vector<32x128xf32>
    %c2888 = arith.constant 2888 : index
    %c0_84 = arith.constant 0 : index
    %174 = vector.load %arg1[%c2888, %c0_84] : memref<3024x256xf32, #tpu.memory_space<vmem>>, vector<128x128xf32>
    %c3016 = arith.constant 3016 : index
    %c0_85 = arith.constant 0 : index
    %175 = vector.load %arg1[%c3016, %c0_85] : memref<3024x256xf32, #tpu.memory_space<vmem>>, vector<1x128xf32>
    %cst_86 = arith.constant dense<0.000000e+00> : vector<32x128xf32>
    %176 = tpu.matmul %173, %174, %cst_86 {dimension_numbers = #tpu.dot_dimension_numbers<[1], [0], [0], [1], [0, 0, 1, 1], [], []>} : vector<32x128xf32>, vector<128x128xf32>, vector<32x128xf32> -> vector<32x128xf32>
    %177 = vector.broadcast %175 : vector<1x128xf32> to vector<32x128xf32>
    %178 = arith.addf %176, %177 : vector<32x128xf32>
    %c0_87 = arith.constant 0 : index
    %c0_88 = arith.constant 0 : index
    %179 = vector.load %arg2[%c0_87, %c0_88] : memref<32x128xf32, #tpu.memory_space<vmem>>, vector<32x128xf32>
    tpu.vector_store %arg2[%c0_87, %c0_88], %178 {strides = array<i32>} : memref<32x128xf32, #tpu.memory_space<vmem>>, vector<32x128xf32>,
    return
  }
}

</mosaic_0001>

<bundles_post_ra>
// kernel: tpu_custom_call.1
= control target key start
LH: loop header
LB: loop body
LE: loop exit
PB: predicated region body
PF: predicated region fallthrough
CT: control target
= control target key end

     0   :  { %7 = vsyncpa [#allocation3], 0  ;;  %s3991_s0 = inlined_call_operand.hbm [shape: f32[32,32], index: 0, kind: input, shape index: {}]   ;;  %s3992_s1 = inlined_call_operand.hbm [shape: f32[3024,256], index: 1, kind: input, shape index: {}]   ;;  %s3993_s2 = inlined_call_operand.hbm [shape: f32[32,128], index: 2, kind: output, shape index: {}]  }
   0x1   :  { %8 = vsyncpa [#allocation6], 0 }
   0x2   :  { %9 = vsyncpa [#allocation4], 0  ;;  %s3821_s9 = smov [#allocation2]  }
   0x3   :  { %s15_s10 = sshll.u32 %s3821_s9, 4  ;;  %s16_s10 = int_to_ptr.vmem [resolvable:$true] %s15_s10 }
   0x4   :  { %s3763_s11 = scalar_lea.vmem %s16_s10, 512  ;;  %p3768_p1 = scmp.lt.s32.totalorder %s16_s10, %s16_s10 }
   0x5   :  { %p3764_p0 = scmp.ne.s32.totalorder %s16_s10, %s3763_s11  ;;  %p3769_p2 = scmp.lt.s32.totalorder %s3763_s11, %s3763_s11 }
   0x7   :  { %p3770_p3 = por %p3769_p2, %p3768_p1 }
   0x9   :  { %p3771_p4 = pnand %p3770_p3, %p3764_p0 }
   0xb   :  { %3774 = shalt.err (!%p3771_p4)
}
   0xc   :  { %s3822_s12 = smov 128   ;;  %s3823_s13 = smov 8  }
   0xd   :  { %21 = dma.hbm_to_vmem [thread:$0]  %s3991_s0, 512, %s16_s10, [#allocation3], %s3822_s12, %s3822_s12, %s3823_s13  }
   0xe   :  { %s3824_s16 = smov [#allocation5]  }
   0xf   :  { %s27_s17 = sshll.u32 %s3824_s16, 4  ;;  %s28_s17 = int_to_ptr.vmem [resolvable:$true] %s27_s17 }
  0x10   :  { %s3783_s18 = scalar_lea.vmem %s28_s17, 96768  ;;  %p3788_p6 = scmp.lt.s32.totalorder %s28_s17, %s28_s17 }
  0x11   :  { %p3784_p5 = scmp.ne.s32.totalorder %s28_s17, %s3783_s18  ;;  %p3789_p7 = scmp.lt.s32.totalorder %s3783_s18, %s3783_s18 }
  0x13   :  { %p3790_p8 = por %p3789_p7, %p3788_p6 }
  0x15   :  { %p3791_p9 = pnand %p3790_p8, %p3784_p5 }
  0x17   :  { %3794 = shalt.err (!%p3791_p9)
}
  0x18   :  { %s3825_s19 = smov 256   ;;  %s3826_s20 = smov 16  }
  0x19   :  { %33 = dma.hbm_to_vmem [thread:$0]  %s3992_s1, 96768, %s28_s17, [#allocation6], %s3825_s19, %s3825_s19, %s3826_s20  }
  0x1a   :  { %3815 = dma.done.wait [#allocation3], 512  }
  0x1b   :  { %3816 = vsyncadd [#allocation3], 4294966784 }
  0x1c   :  { %3817 = dma.done.wait [#allocation6], 96768  }
  0x1d   :  { %3818 = vsyncadd [#allocation6], 4294870528  ;;  %v3827_v0 = vmov 0.0   ;;  %v51_v1 = vld [vmem:[#allocation5 + $0x38] sm:$0xff]  ;;  %v50_v2 = vld [vmem:[#allocation5 + $0x30] sm:$0xff]  ;;  %vm65_vm0 = vcmask 261120   ;;  %v55_v54 = vlaneseq }
  0x1e   :  { %142 = vmatprep.mubr.f32.mxu0 %v3827_v0  ;;  %v49_v3 = vld [vmem:[#allocation5 + $0x28] sm:$0xff]  ;;  %102 = vmatprep.subr.mxu0 %v51_v1  ;;  %v48_v4 = vld [vmem:[#allocation5 + $0x20] sm:$0xff]  ;;  %v47_v5 = vld [vmem:[#allocation5 + $0x18] sm:$0xff]  ;;  %s3828_s0 = smov [#allocation7]  }
  0x1f   :  { %103 = vmatpush1.msra.mxu0 %v50_v2  ;;  %v46_v6 = vld [vmem:[#allocation5 + $0x10] sm:$0xff]  ;;  %v45_v7 = vld [vmem:[#allocation5 + $0x8] sm:$0xff]  ;;  %v198_v8 = vld [vmem:[#allocation5 + $0x240] sm:$0xff]  ;;  %v56_v55 = vshrl.u32 %v55_v54, 7  ;;  %s2526_s1 = sshll.u32 %s3828_s0, 4  ;;  %s2527_s1 = int_to_ptr.vmem [resolvable:$true] %s2526_s1 }
  0x20   :  { %104 = vmatprep.subr.mxu0 %v49_v3  ;;  %v182_v9 = vld [vmem:[#allocation5 + $0x140] sm:$0xff]  ;;  %v197_v10 = vld [vmem:[#allocation5 + $0x230] sm:$0xff]  ;;  %2543 = vmatprep.subr.mxu1 %v198_v8  ;;  %v41_v18 = vld [vmem:[#allocation2 + $0x8] sm:$0xff]  ;;  %s3795_s23 = scalar_lea.vmem %s2527_s1, 512  ;;  %p3800_p11 = scmp.lt.s32.totalorder %s2527_s1, %s2527_s1 }
  0x21   :  { %105 = vmatpush1.msra.mxu0 %v48_v4  ;;  %v44_v11 = vld [vmem:[#allocation5] sm:$0xff]  ;;  %v181_v12 = vld [vmem:[#allocation5 + $0x130] sm:$0xff]  ;;  %2544 = vmatpush3.msra.mxu1 %v182_v9  ;;  %v43_v28 = vld [vmem:[#allocation2 + $0x18] sm:$0xff]  ;;  %v61_v56 = vsub.s32 1, %v56_v55  ;;  %v57_v57 = vsub.s32 0, %v56_v55  ;;  %p3796_p10 = scmp.ne.s32.totalorder %s2527_s1, %s3795_s23  ;;  %p3801_p12 = scmp.lt.s32.totalorder %s3795_s23, %s3795_s23 }
  0x22   :  { %106 = vmatprep.subr.mxu0 %v47_v5  ;;  %v40_v13 = vld [vmem:[#allocation2] sm:$0xff]  ;;  %2545 = vmatprep.subr.mxu1 %v197_v10  ;;  %v195_v16 = vld [vmem:[#allocation5 + $0x210] sm:$0xff] }
  0x23   :  { %107 = vmatpush1.msra.mxu0 %v46_v6  ;;  %v196_v14 = vld [vmem:[#allocation5 + $0x220] sm:$0xff]  ;;  %2546 = vmatpush3.msra.mxu1 %v181_v12  ;;  %v179_v17 = vld [vmem:[#allocation5 + $0x110] sm:$0xff]  ;;  %p3802_p13 = por %p3801_p12, %p3800_p11 }
  0x24   :  { %108 = vmatprep.subr.mxu0 %v45_v7  ;;  %v180_v15 = vld [vmem:[#allocation5 + $0x120] sm:$0xff]  ;;  %2547 = vmatprep.subr.mxu1 %v196_v14  ;;  %v193_v21 = vld [vmem:[#allocation5 + $0x1f0] sm:$0xff] }
  0x25   :  { %109 = vmatpush1.msra.mxu0 %v44_v11  ;;  %2548 = vmatpush3.msra.mxu1 %v180_v15  ;;  %v194_v19 = vld [vmem:[#allocation5 + $0x200] sm:$0xff]  ;;  %v177_v22 = vld [vmem:[#allocation5 + $0xf0] sm:$0xff]  ;;  %p3803_p0 = pnand %p3802_p13, %p3796_p10 }
  0x26   :  { %2539 = vmatmul.mubr.msk.f32.vlgmr.msra.gmra.mxu0 %vm65_vm0, %v40_v13  ;;  %2549 = vmatprep.subr.mxu1 %v195_v16  ;;  %v178_v20 = vld [vmem:[#allocation5 + $0x100] sm:$0xff]  ;;  %v42_v23 = vld [vmem:[#allocation2 + $0x10] sm:$0xff] }
  0x27   :  { %148 = vmatprep.mubr.f32.mxu0 %v3827_v0  ;;  %2550 = vmatpush3.msra.mxu1 %v179_v17  ;;  %v192_v24 = vld [vmem:[#allocation5 + $0x1e0] sm:$0xff]  ;;  %v191_v26 = vld [vmem:[#allocation5 + $0x1d0] sm:$0xff] }
  0x28   :  { %2551 = vmatprep.subr.mxu1 %v194_v19  ;;  %v176_v25 = vld [vmem:[#allocation5 + $0xe0] sm:$0xff]  ;;  %v175_v27 = vld [vmem:[#allocation5 + $0xd0] sm:$0xff] }
  0x29   :  { %2552 = vmatpush3.msra.mxu1 %v178_v20  ;;  %v190_v29 = vld [vmem:[#allocation5 + $0x1c0] sm:$0xff]  ;;  %v189_v31 = vld [vmem:[#allocation5 + $0x1b0] sm:$0xff] }
  0x2a   :  { %2540 = vmatmul.mubr.msk.f32.gmra.mxu0 %vm65_vm0, %v41_v18  ;;  %2553 = vmatprep.subr.mxu1 %v193_v21  ;;  %v174_v30 = vld [vmem:[#allocation5 + $0xc0] sm:$0xff]  ;;  %v173_v32 = vld [vmem:[#allocation5 + $0xb0] sm:$0xff] }
  0x2b   :  { %154 = vmatprep.mubr.f32.mxu0 %v3827_v0  ;;  %2554 = vmatpush3.msra.mxu1 %v177_v22  ;;  %v188_v33 = vld [vmem:[#allocation5 + $0x1a0] sm:$0xff]  ;;  %v187_v35 = vld [vmem:[#allocation5 + $0x190] sm:$0xff] }
  0x2c   :  { %2555 = vmatprep.subr.mxu1 %v192_v24  ;;  %v172_v34 = vld [vmem:[#allocation5 + $0xa0] sm:$0xff]  ;;  %v171_v36 = vld [vmem:[#allocation5 + $0x90] sm:$0xff] }
  0x2d   :  { %2556 = vmatpush3.msra.mxu1 %v176_v25  ;;  %v186_v37 = vld [vmem:[#allocation5 + $0x180] sm:$0xff]  ;;  %v185_v39 = vld [vmem:[#allocation5 + $0x170] sm:$0xff] }
  0x2e   :  { %2541 = vmatmul.mubr.msk.f32.gmra.mxu0 %vm65_vm0, %v42_v23  ;;  %2557 = vmatprep.subr.mxu1 %v191_v26  ;;  %v170_v38 = vld [vmem:[#allocation5 + $0x80] sm:$0xff]  ;;  %v169_v40 = vld [vmem:[#allocation5 + $0x70] sm:$0xff] }
  0x2f   :  { %160 = vmatprep.mubr.f32.mxu0 %v3827_v0  ;;  %2558 = vmatpush3.msra.mxu1 %v175_v27  ;;  %v184_v41 = vld [vmem:[#allocation5 + $0x160] sm:$0xff]  ;;  %v183_v43 = vld [vmem:[#allocation5 + $0x150] sm:$0xff] }
  0x30   :  { %2559 = vmatprep.subr.mxu1 %v190_v29  ;;  %v168_v42 = vld [vmem:[#allocation5 + $0x60] sm:$0xff]  ;;  %v167_v44 = vld [vmem:[#allocation5 + $0x50] sm:$0xff] }
  0x31   :  { %2560 = vmatpush3.msra.mxu1 %v174_v30  ;;  %v308_v45 = vld [vmem:[#allocation5 + $0x350] sm:$0xff]  ;;  %v307_v46 = vld [vmem:[#allocation5 + $0x340] sm:$0xff] }
  0x32   :  { %2542 = vmatmul.mubr.msk.f32.gmra.mxu0 %vm65_vm0, %v43_v28  ;;  %2561 = vmatprep.subr.mxu1 %v189_v31  ;;  %v306_v47 = vld [vmem:[#allocation5 + $0x330] sm:$0xff]  ;;  %v305_v48 = vld [vmem:[#allocation5 + $0x320] sm:$0xff] }
  0x33   :  { %2562 = vmatpush3.msra.mxu1 %v173_v32  ;;  %2987 = vmatprep.subr.mxu0 %v308_v45  ;;  %v304_v49 = vld [vmem:[#allocation5 + $0x310] sm:$0xff]  ;;  %v303_v50 = vld [vmem:[#allocation5 + $0x300] sm:$0xff] }
  0x34   :  { %2563 = vmatprep.subr.mxu1 %v188_v33  ;;  %2988 = vmatpush3.msra.mxu0 %v308_v45  ;;  %v302_v51 = vld [vmem:[#allocation5 + $0x2f0] sm:$0xff]  ;;  %v301_v52 = vld [vmem:[#allocation5 + $0x2e0] sm:$0xff] }
  0x35   :  { %2564 = vmatpush3.msra.mxu1 %v172_v34  ;;  %2989 = vmatprep.subr.mxu0 %v307_v46  ;;  %v300_v53 = vld [vmem:[#allocation5 + $0x2d0] sm:$0xff]  ;;  %v53_v58 = vld [vmem:[#allocation5 + $0x40] ss:$8 sm:$0x3] }
  0x36   :  { %2565 = vmatprep.subr.mxu1 %v187_v35  ;;  %2990 = vmatpush3.msra.mxu0 %v307_v46  ;;  %v62_v59 = vrot.slane %v53_v58, %v61_v56  ;;  %v58_v60 = vrot.slane %v53_v58, %v57_v57  ;;  %v299_v13 = vld [vmem:[#allocation5 + $0x2c0] sm:$0xff]  ;;  %v298_v14 = vld [vmem:[#allocation5 + $0x2b0] sm:$0xff] }
  0x37   :  { %2566 = vmatpush3.msra.mxu1 %v171_v36  ;;  %2991 = vmatprep.subr.mxu0 %v306_v47  ;;  %v297_v15 = vld [vmem:[#allocation5 + $0x2a0] sm:$0xff]  ;;  %v296_v16 = vld [vmem:[#allocation5 + $0x290] sm:$0xff] }
  0x38   :  { %2567 = vmatprep.subr.mxu1 %v186_v37  ;;  %2992 = vmatpush3.msra.mxu0 %v306_v47  ;;  %v295_v17 = vld [vmem:[#allocation5 + $0x280] sm:$0xff]  ;;  %v294_v18 = vld [vmem:[#allocation5 + $0x270] sm:$0xff] }
  0x39   :  { %2568 = vmatpush3.msra.mxu1 %v170_v38  ;;  %2993 = vmatprep.subr.mxu0 %v305_v48  ;;  %v293_v19 = vld [vmem:[#allocation5 + $0x260] sm:$0xff]  ;;  %v417_v21 = vld [vmem:[#allocation5 + $0x450] sm:$0xff] }
  0x3a   :  { %2569 = vmatprep.subr.mxu1 %v185_v39  ;;  %2994 = vmatpush3.msra.mxu0 %v305_v48  ;;  %v418_v20 = vld [vmem:[#allocation5 + $0x460] sm:$0xff]  ;;  %v415_v23 = vld [vmem:[#allocation5 + $0x430] sm:$0xff] }
  0x3b   :  { %2570 = vmatpush3.msra.mxu1 %v169_v40  ;;  %2995 = vmatprep.subr.mxu0 %v304_v49  ;;  %v416_v22 = vld [vmem:[#allocation5 + $0x440] sm:$0xff]  ;;  %v413_v25 = vld [vmem:[#allocation5 + $0x410] sm:$0xff] }
  0x3c   :  { %2571 = vmatprep.subr.mxu1 %v184_v41  ;;  %2996 = vmatpush3.msra.mxu0 %v304_v49  ;;  %v414_v24 = vld [vmem:[#allocation5 + $0x420] sm:$0xff]  ;;  %v411_v27 = vld [vmem:[#allocation5 + $0x3f0] sm:$0xff] }
  0x3d   :  { %2572 = vmatpush3.msra.mxu1 %v168_v42  ;;  %2997 = vmatprep.subr.mxu0 %v303_v50  ;;  %v412_v26 = vld [vmem:[#allocation5 + $0x400] sm:$0xff]  ;;  %v409_v29 = vld [vmem:[#allocation5 + $0x3d0] sm:$0xff] }
  0x3e   :  { %2573 = vmatprep.subr.mxu1 %v183_v43  ;;  %2998 = vmatpush3.msra.mxu0 %v303_v50  ;;  %v410_v28 = vld [vmem:[#allocation5 + $0x3e0] sm:$0xff]  ;;  %v199_v32 = vld [vmem:[#allocation5 + $0x250] ss:$0 sm:$0xff] }
  0x3f   :  { %2574 = vmatpush3.msra.mxu1 %v167_v44  ;;  %2999 = vmatprep.subr.mxu0 %v302_v51  ;;  %v408_v30 = vld [vmem:[#allocation5 + $0x3c0] sm:$0xff]  ;;  %v407_v56 = vld [vmem:[#allocation5 + $0x3b0] sm:$0xff] }
  0x40   :  { %3000 = vmatpush3.msra.mxu0 %v302_v51  ;;  %3025 = vmatprep.subr.mxu1 %v418_v20  ;;  %v406_v57 = vld [vmem:[#allocation5 + $0x3a0] sm:$0xff]  ;;  %v405_v58 = vld [vmem:[#allocation5 + $0x390] sm:$0xff] }
  0x41   :  { %3001 = vmatprep.subr.mxu0 %v301_v52 }
  0x42   :  { %3002 = vmatpush3.msra.mxu0 %v301_v52 }
  0x43   :  { %3003 = vmatprep.subr.mxu0 %v300_v53 }
  0x44   :  { %3004 = vmatpush3.msra.mxu0 %v300_v53 }
  0x45   :  { %3005 = vmatprep.subr.mxu0 %v299_v13 }
  0x46   :  { %3006 = vmatpush3.msra.mxu0 %v299_v13 }
  0x47   :  { %3007 = vmatprep.subr.mxu0 %v298_v14 }
  0x48   :  { %3008 = vmatpush3.msra.mxu0 %v298_v14 }
  0x49   :  { %3009 = vmatprep.subr.mxu0 %v297_v15 }
  0x4a   :  { %3010 = vmatpush3.msra.mxu0 %v297_v15 }
  0x4b   :  { %3011 = vmatprep.subr.mxu0 %v296_v16 }
  0x4c   :  { %3012 = vmatpush3.msra.mxu0 %v296_v16 }
  0x4d   :  { %3013 = vmatprep.subr.mxu0 %v295_v17 }
  0x4e   :  { %3014 = vmatpush3.msra.mxu0 %v295_v17 }
  0x4f   :  { %3015 = vmatprep.subr.mxu0 %v294_v18 }
  0x50   :  { %3016 = vmatpush3.msra.mxu0 %v294_v18 }
  0x51   :  { %3017 = vmatprep.subr.mxu0 %v293_v19 }
  0x52   :  { %3018 = vmatpush3.msra.mxu0 %v293_v19 }
  0xe6   :  { %v144_v61 = vpop.f32.mrf.mxu0 }
  0xe7   :  { %v145_v0 = vadd.f32 %v144_v61, %v58_v60  ;;  %v532_v61 = vld [vmem:[#allocation5 + $0x570] sm:$0xff] }
  0xe8   :  { %v146_v62 = vpop.f32.mrf.mxu0  ;;  %3063 = vmatprep.subr.mxu0 %v532_v61 }
  0xe9   :  { %v147_v63 = vadd.f32 %v146_v62, %v62_v59  ;;  %v531_v62 = vld [vmem:[#allocation5 + $0x560] sm:$0xff] }
  0xea   :  { %v150_v1 = vpop.f32.mrf.mxu0 }
  0xeb   :  { %264 = vmatprep.mubr.f32.mxu1 %v147_v63  ;;  %v151_v4 = vadd.f32 %v150_v1, %v58_v60  ;;  %v530_v63 = vld [vmem:[#allocation5 + $0x550] sm:$0xff] }
  0xec   :  { %v152_v2 = vpop.f32.mrf.mxu0  ;;  %265 = vmatmul.mubr.f32.vlgmr.msra.gmra.mxu1 %v145_v0  ;;  %v529_v0 = vld [vmem:[#allocation5 + $0x540] sm:$0xff]  ;;  %v528_v1 = vld [vmem:[#allocation5 + $0x530] sm:$0xff] }
  0xed   :  { %v153_v3 = vadd.f32 %v152_v2, %v62_v59  ;;  %3026 = vmatpush3.msra.mxu1 %v418_v20  ;;  %v527_v2 = vld [vmem:[#allocation5 + $0x520] sm:$0xff] }
  0xee   :  { %v156_v5 = vpop.f32.mrf.mxu0  ;;  %3027 = vmatprep.subr.mxu1 %v417_v21 }
  0xef   :  { %269 = vmatprep.mubr.f32.mxu1 %v153_v3  ;;  %v157_v8 = vadd.f32 %v156_v5, %v58_v60  ;;  %3028 = vmatpush3.msra.mxu1 %v417_v21  ;;  %v526_v3 = vld [vmem:[#allocation5 + $0x510] sm:$0xff] }
  0xf0   :  { %v158_v6 = vpop.f32.mrf.mxu0  ;;  %270 = vmatmul.mubr.f32.gmra.mxu1 %v151_v4  ;;  %3029 = vmatprep.subr.mxu1 %v416_v22  ;;  %v525_v4 = vld [vmem:[#allocation5 + $0x500] sm:$0xff]  ;;  %v524_v5 = vld [vmem:[#allocation5 + $0x4f0] sm:$0xff] }
  0xf1   :  { %v159_v7 = vadd.f32 %v158_v6, %v62_v59  ;;  %3030 = vmatpush3.msra.mxu1 %v416_v22  ;;  %v523_v6 = vld [vmem:[#allocation5 + $0x4e0] sm:$0xff] }
  0xf2   :  { %v162_v9 = vpop.f32.mrf.mxu0  ;;  %3031 = vmatprep.subr.mxu1 %v415_v23 }
  0xf3   :  { %274 = vmatprep.mubr.f32.mxu1 %v159_v7  ;;  %v163_v12 = vadd.f32 %v162_v9, %v58_v60  ;;  %3032 = vmatpush3.msra.mxu1 %v415_v23  ;;  %v403_v60 = vld [vmem:[#allocation5 + $0x370] sm:$0xff]  ;;  %v309_v7 = vld [vmem:[#allocation5 + $0x360] ss:$0 sm:$0xff] }
  0xf4   :  { %v164_v10 = vpop.f32.mrf.mxu0  ;;  %275 = vmatmul.mubr.f32.gmra.mxu1 %v157_v8  ;;  %3033 = vmatprep.subr.mxu1 %v414_v24 }
  0xf5   :  { %v165_v11 = vadd.f32 %v164_v10, %v62_v59  ;;  %3034 = vmatpush3.msra.mxu1 %v414_v24  ;;  %v404_v59 = vld [vmem:[#allocation5 + $0x380] sm:$0xff]  ;;  %v522_v24 = vld [vmem:[#allocation5 + $0x4d0] sm:$0xff] }
  0xf6   :  { %3035 = vmatprep.subr.mxu1 %v413_v25 }
  0xf7   :  { %279 = vmatprep.mubr.f32.mxu1 %v165_v11  ;;  %3036 = vmatpush3.msra.mxu1 %v413_v25  ;;  %v521_v25 = vld [vmem:[#allocation5 + $0x4c0] sm:$0xff] }
  0xf8   :  { %280 = vmatmul.mubr.f32.gmra.mxu1 %v163_v12  ;;  %3037 = vmatprep.subr.mxu1 %v412_v26 }
  0xf9   :  { %3038 = vmatpush3.msra.mxu1 %v412_v26  ;;  %v520_v26 = vld [vmem:[#allocation5 + $0x4b0] sm:$0xff] }
  0xfa   :  { %3039 = vmatprep.subr.mxu1 %v411_v27 }
  0xfb   :  { %3040 = vmatpush3.msra.mxu1 %v411_v27  ;;  %v519_v27 = vld [vmem:[#allocation5 + $0x4a0] sm:$0xff] }
  0xfc   :  { %3041 = vmatprep.subr.mxu1 %v410_v28 }
  0xfd   :  { %3042 = vmatpush3.msra.mxu1 %v410_v28  ;;  %v518_v28 = vld [vmem:[#allocation5 + $0x490] sm:$0xff] }
  0xfe   :  { %3043 = vmatprep.subr.mxu1 %v409_v29 }
  0xff   :  { %3044 = vmatpush3.msra.mxu1 %v409_v29  ;;  %v517_v29 = vld [vmem:[#allocation5 + $0x480] sm:$0xff] }
 0x100   :  { %3045 = vmatprep.subr.mxu1 %v408_v30 }
 0x101   :  { %3046 = vmatpush3.msra.mxu1 %v408_v30  ;;  %v642_v30 = vld [vmem:[#allocation5 + $0x680] sm:$0xff] }
 0x102   :  { %3047 = vmatprep.subr.mxu1 %v407_v56 }
 0x103   :  { %3048 = vmatpush3.msra.mxu1 %v407_v56 }
 0x104   :  { %3049 = vmatprep.subr.mxu1 %v406_v57 }
 0x105   :  { %3050 = vmatpush3.msra.mxu1 %v406_v57 }
 0x106   :  { %3051 = vmatprep.subr.mxu1 %v405_v58 }
 0x107   :  { %3052 = vmatpush3.msra.mxu1 %v405_v58 }
 0x108   :  { %3053 = vmatprep.subr.mxu1 %v404_v59 }
 0x109   :  { %3054 = vmatpush3.msra.mxu1 %v404_v59 }
 0x10a   :  { %3055 = vmatprep.subr.mxu1 %v403_v60 }
 0x10b   :  { %3056 = vmatpush3.msra.mxu1 %v403_v60 }
 0x10c   :  { %3101 = vmatprep.subr.mxu1 %v642_v30 }
 0x1ac   :  { %v2575_v31 = vpop.f32.mrf.mxu1 }
 0x1ae   :  { %v2576_v33 = vpop.f32.mrf.mxu1 }
 0x1af   :  { %v2577_v34 = vadd.f32 %v2576_v33, %v2575_v31  ;;  %v641_v31 = vld [vmem:[#allocation5 + $0x670] sm:$0xff] }
 0x1b0   :  { %v2578_v35 = vpop.f32.mrf.mxu1  ;;  %v639_v33 = vld [vmem:[#allocation5 + $0x650] sm:$0xff] }
 0x1b1   :  { %v267_v36 = vadd.f32 %v2577_v34, %v199_v32  ;;  %v638_v34 = vld [vmem:[#allocation5 + $0x640] sm:$0xff] }
 0x1b2   :  { %v2579_v37 = vpop.f32.mrf.mxu1 }
 0x1b3   :  { %v285_v38 = vmul.f32 0.01, %v267_v36  ;;  %v2580_v39 = vadd.f32 %v2579_v37, %v2578_v35  ;;  %v637_v35 = vld [vmem:[#allocation5 + $0x630] sm:$0xff] }
 0x1b4   :  { %v2581_v40 = vpop.f32.mrf.mxu1  ;;  %v635_v37 = vld [vmem:[#allocation5 + $0x610] sm:$0xff] }
 0x1b5   :  { %v272_v41 = vadd.f32 %v2580_v39, %v199_v32  ;;  %v3857_v42 = vmax.f32 %v267_v36, %v285_v38  ;;  %v636_v36 = vld [vmem:[#allocation5 + $0x620] sm:$0xff]  ;;  %v633_v39 = vld [vmem:[#allocation5 + $0x5f0] sm:$0xff] }
 0x1b6   :  { %v2582_v43 = vpop.f32.mrf.mxu1  ;;  %v634_v38 = vld [vmem:[#allocation5 + $0x600] sm:$0xff] }
 0x1b7   :  { %v286_v44 = vmul.f32 0.01, %v272_v41  ;;  %v2583_v45 = vadd.f32 %v2582_v43, %v2581_v40  ;;  %3019 = vmatprep.mubr.f32.mxu0 %v3857_v42  ;;  %v632_v40 = vld [vmem:[#allocation5 + $0x5e0] sm:$0xff] }
 0x1b8   :  { %v2584_v46 = vpop.f32.mrf.mxu1 }
 0x1b9   :  { %v3860_v47 = vmax.f32 %v272_v41, %v286_v44  ;;  %v277_v48 = vadd.f32 %v2583_v45, %v199_v32  ;;  %v419_v41 = vld [vmem:[#allocation5 + $0x470] ss:$0 sm:$0xff] }
 0x1ba   :  { %v2585_v49 = vpop.f32.mrf.mxu1 }
 0x1bb   :  { %v287_v50 = vmul.f32 0.01, %v277_v48  ;;  %v2586_v51 = vadd.f32 %v2585_v49, %v2584_v46  ;;  %3020 = vmatmul.mubr.f32.vlgmr.msra.gmra.mxu0 %v3860_v47 }
 0x1bc   :  { %3064 = vmatpush3.msra.mxu0 %v532_v61 }
 0x1bd   :  { %v282_v52 = vadd.f32 %v2586_v51, %v199_v32  ;;  %v3863_v53 = vmax.f32 %v277_v48, %v287_v50  ;;  %3065 = vmatprep.subr.mxu0 %v531_v62  ;;  %v640_v32 = vld [vmem:[#allocation5 + $0x660] sm:$0xff] }
 0x1be   :  { %3066 = vmatpush3.msra.mxu0 %v531_v62 }
 0x1bf   :  { %v288_v54 = vmul.f32 0.01, %v282_v52  ;;  %3022 = vmatprep.mubr.f32.mxu0 %v3863_v53  ;;  %3067 = vmatprep.subr.mxu0 %v530_v63 }
 0x1c0   :  { %3068 = vmatpush3.msra.mxu0 %v530_v63 }
 0x1c1   :  { %v3866_v55 = vmax.f32 %v282_v52, %v288_v54  ;;  %3069 = vmatprep.subr.mxu0 %v529_v0 }
 0x1c2   :  { %3070 = vmatpush3.msra.mxu0 %v529_v0 }
 0x1c3   :  { %3023 = vmatmul.mubr.f32.gmra.mxu0 %v3866_v55  ;;  %3071 = vmatprep.subr.mxu0 %v528_v1 }
 0x1c4   :  { %3072 = vmatpush3.msra.mxu0 %v528_v1 }
 0x1c5   :  { %3073 = vmatprep.subr.mxu0 %v527_v2 }
 0x1c6   :  { %3074 = vmatpush3.msra.mxu0 %v527_v2  ;;  %v629_v2 = vld [vmem:[#allocation5 + $0x5b0] sm:$0xff] }
 0x1c7   :  { %3075 = vmatprep.subr.mxu0 %v526_v3 }
 0x1c8   :  { %3076 = vmatpush3.msra.mxu0 %v526_v3  ;;  %v628_v3 = vld [vmem:[#allocation5 + $0x5a0] sm:$0xff] }
 0x1c9   :  { %3077 = vmatprep.subr.mxu0 %v525_v4 }
 0x1ca   :  { %3078 = vmatpush3.msra.mxu0 %v525_v4  ;;  %v755_v4 = vld [vmem:[#allocation5 + $0x780] sm:$0xff] }
 0x1cb   :  { %3079 = vmatprep.subr.mxu0 %v524_v5 }
 0x1cc   :  { %3080 = vmatpush3.msra.mxu0 %v524_v5  ;;  %v754_v5 = vld [vmem:[#allocation5 + $0x770] sm:$0xff] }
 0x1cd   :  { %3081 = vmatprep.subr.mxu0 %v523_v6 }
 0x1ce   :  { %3082 = vmatpush3.msra.mxu0 %v523_v6  ;;  %v753_v6 = vld [vmem:[#allocation5 + $0x760] sm:$0xff] }
 0x1cf   :  { %3083 = vmatprep.subr.mxu0 %v522_v24 }
 0x1d0   :  { %3084 = vmatpush3.msra.mxu0 %v522_v24 }
 0x1d1   :  { %3085 = vmatprep.subr.mxu0 %v521_v25 }
 0x1d2   :  { %3086 = vmatpush3.msra.mxu0 %v521_v25 }
 0x1d3   :  { %3087 = vmatprep.subr.mxu0 %v520_v26 }
 0x1d4   :  { %3088 = vmatpush3.msra.mxu0 %v520_v26 }
 0x1d5   :  { %3089 = vmatprep.subr.mxu0 %v519_v27 }
 0x1d6   :  { %3090 = vmatpush3.msra.mxu0 %v519_v27 }
 0x1d7   :  { %3091 = vmatprep.subr.mxu0 %v518_v28 }
 0x1d8   :  { %3092 = vmatpush3.msra.mxu0 %v518_v28 }
 0x1d9   :  { %3093 = vmatprep.subr.mxu0 %v517_v29 }
 0x1da   :  { %3094 = vmatpush3.msra.mxu0 %v517_v29 }
 0x27b   :  { %v3021_v8 = vpop.f32.mrf.mxu0 }
 0x27c   :  { %v382_v9 = vadd.f32 %v3021_v8, %v309_v7  ;;  %v751_v8 = vld [vmem:[#allocation5 + $0x740] sm:$0xff] }
 0x27d   :  { %v376_v10 = vpop.f32.mrf.mxu0 }
 0x27e   :  { %v377_v11 = vadd.f32 %v376_v10, %v309_v7  ;;  %v396_v12 = vmul.f32 0.01, %v382_v9  ;;  %v749_v10 = vld [vmem:[#allocation5 + $0x720] sm:$0xff] }
 0x280   :  { %v395_v13 = vmul.f32 0.01, %v377_v11  ;;  %v400_v15 = vmax.f32 %v382_v9, %v396_v12  ;;  %v750_v9 = vld [vmem:[#allocation5 + $0x730] sm:$0xff]  ;;  %v747_v12 = vld [vmem:[#allocation5 + $0x700] sm:$0xff] }
 0x282   :  { %v399_v14 = vmax.f32 %v377_v11, %v395_v13  ;;  %v748_v11 = vld [vmem:[#allocation5 + $0x710] sm:$0xff]  ;;  %v533_v13 = vld [vmem:[#allocation5 + $0x580] ss:$0 sm:$0xff] }
 0x283   :  { %v3024_v16 = vpop.f32.mrf.mxu0 }
 0x284   :  { %v392_v17 = vadd.f32 %v3024_v16, %v309_v7  ;;  %3057 = vmatprep.mubr.f32.mxu1 %v399_v14 }
 0x285   :  { %v386_v18 = vpop.f32.mrf.mxu0  ;;  %3058 = vmatmul.mubr.f32.vlgmr.msra.gmra.mxu1 %v400_v15 }
 0x286   :  { %v387_v19 = vadd.f32 %v386_v18, %v309_v7  ;;  %v398_v20 = vmul.f32 0.01, %v392_v17  ;;  %3102 = vmatpush3.msra.mxu1 %v642_v30  ;;  %v752_v7 = vld [vmem:[#allocation5 + $0x750] sm:$0xff] }
 0x287   :  { %3103 = vmatprep.subr.mxu1 %v641_v31  ;;  %v746_v30 = vld [vmem:[#allocation5 + $0x6f0] sm:$0xff] }
 0x288   :  { %v397_v21 = vmul.f32 0.01, %v387_v19  ;;  %v402_v23 = vmax.f32 %v392_v17, %v398_v20  ;;  %3104 = vmatpush3.msra.mxu1 %v641_v31  ;;  %v745_v31 = vld [vmem:[#allocation5 + $0x6e0] sm:$0xff] }
 0x289   :  { %3105 = vmatprep.subr.mxu1 %v640_v32 }
 0x28a   :  { %v401_v22 = vmax.f32 %v387_v19, %v397_v21  ;;  %3106 = vmatpush3.msra.mxu1 %v640_v32  ;;  %v744_v32 = vld [vmem:[#allocation5 + $0x6d0] sm:$0xff] }
 0x28b   :  { %3107 = vmatprep.subr.mxu1 %v639_v33 }
 0x28c   :  { %3060 = vmatprep.mubr.f32.mxu1 %v401_v22  ;;  %3108 = vmatpush3.msra.mxu1 %v639_v33  ;;  %v743_v33 = vld [vmem:[#allocation5 + $0x6c0] sm:$0xff] }
 0x28d   :  { %3061 = vmatmul.mubr.f32.gmra.mxu1 %v402_v23  ;;  %3109 = vmatprep.subr.mxu1 %v638_v34 }
 0x28e   :  { %3110 = vmatpush3.msra.mxu1 %v638_v34  ;;  %v742_v34 = vld [vmem:[#allocation5 + $0x6b0] sm:$0xff] }
 0x28f   :  { %3111 = vmatprep.subr.mxu1 %v637_v35 }
 0x290   :  { %3112 = vmatpush3.msra.mxu1 %v637_v35  ;;  %v741_v35 = vld [vmem:[#allocation5 + $0x6a0] sm:$0xff] }
 0x291   :  { %3113 = vmatprep.subr.mxu1 %v636_v36 }
 0x292   :  { %3114 = vmatpush3.msra.mxu1 %v636_v36  ;;  %v866_v36 = vld [vmem:[#allocation5 + $0x8a0] sm:$0xff] }
 0x293   :  { %3115 = vmatprep.subr.mxu1 %v635_v37 }
 0x294   :  { %3116 = vmatpush3.msra.mxu1 %v635_v37  ;;  %v865_v37 = vld [vmem:[#allocation5 + $0x890] sm:$0xff] }
 0x295   :  { %3117 = vmatprep.subr.mxu1 %v634_v38 }
 0x296   :  { %3118 = vmatpush3.msra.mxu1 %v634_v38  ;;  %v864_v38 = vld [vmem:[#allocation5 + $0x880] sm:$0xff] }
 0x297   :  { %3119 = vmatprep.subr.mxu1 %v633_v39 }
 0x298   :  { %3120 = vmatpush3.msra.mxu1 %v633_v39  ;;  %v863_v39 = vld [vmem:[#allocation5 + $0x870] sm:$0xff] }
 0x299   :  { %3121 = vmatprep.subr.mxu1 %v632_v40 }
 0x29a   :  { %3122 = vmatpush3.msra.mxu1 %v632_v40  ;;  %v862_v40 = vld [vmem:[#allocation5 + $0x860] sm:$0xff] }
 0x345   :  { %v3059_v43 = vpop.f32.mrf.mxu1 }
 0x346   :  { %v492_v44 = vadd.f32 %v3059_v43, %v419_v41  ;;  %v860_v43 = vld [vmem:[#allocation5 + $0x840] sm:$0xff] }
 0x347   :  { %v486_v45 = vpop.f32.mrf.mxu1 }
 0x348   :  { %v506_v46 = vmul.f32 0.01, %v492_v44  ;;  %v487_v48 = vadd.f32 %v486_v45, %v419_v41  ;;  %v858_v45 = vld [vmem:[#allocation5 + $0x820] sm:$0xff] }
 0x34a   :  { %v505_v49 = vmul.f32 0.01, %v487_v48  ;;  %v510_v50 = vmax.f32 %v492_v44, %v506_v46  ;;  %v859_v44 = vld [vmem:[#allocation5 + $0x830] sm:$0xff] }
 0x34b   :  { %v857_v46 = vld [vmem:[#allocation5 + $0x810] sm:$0xff] }
 0x34c   :  { %v509_v51 = vmax.f32 %v487_v48, %v505_v49  ;;  %v3873_v57 = vadd.f32 %v510_v50, %v3860_v47  ;;  %v630_v47 = vld [vmem:[#allocation5 + $0x5c0] sm:$0xff]  ;;  %v643_v49 = vld [vmem:[#allocation5 + $0x690] ss:$0 sm:$0xff] }
 0x34d   :  { %v3062_v52 = vpop.f32.mrf.mxu1  ;;  %v856_v48 = vld [vmem:[#allocation5 + $0x800] sm:$0xff] }
 0x34e   :  { %v502_v54 = vadd.f32 %v3062_v52, %v419_v41  ;;  %v3870_v56 = vadd.f32 %v509_v51, %v3857_v42  ;;  %v631_v42 = vld [vmem:[#allocation5 + $0x5d0] sm:$0xff] }
 0x34f   :  { %v496_v58 = vpop.f32.mrf.mxu1  ;;  %3123 = vmatprep.subr.mxu1 %v631_v42 }
 0x350   :  { %v508_v59 = vmul.f32 0.01, %v502_v54  ;;  %v497_v60 = vadd.f32 %v496_v58, %v419_v41  ;;  %3095 = vmatprep.mubr.f32.mxu0 %v3870_v56  ;;  %3124 = vmatpush3.msra.mxu1 %v631_v42  ;;  %v861_v41 = vld [vmem:[#allocation5 + $0x850] sm:$0xff] }
 0x351   :  { %3096 = vmatmul.mubr.f32.vlgmr.msra.gmra.mxu0 %v3873_v57  ;;  %3125 = vmatprep.subr.mxu1 %v630_v47 }
 0x352   :  { %v507_v61 = vmul.f32 0.01, %v497_v60  ;;  %v512_v62 = vmax.f32 %v502_v54, %v508_v59  ;;  %3126 = vmatpush3.msra.mxu1 %v630_v47 }
 0x353   :  { %3127 = vmatprep.subr.mxu1 %v629_v2 }
 0x354   :  { %v511_v63 = vmax.f32 %v497_v60, %v507_v61  ;;  %v3881_v1 = vadd.f32 %v512_v62, %v3866_v55  ;;  %3128 = vmatpush3.msra.mxu1 %v629_v2  ;;  %v756_v55 = vld [vmem:[#allocation5 + $0x790] sm:$0xff] }
 0x355   :  { %3129 = vmatprep.subr.mxu1 %v628_v3  ;;  %3139 = vmatprep.subr.mxu0 %v756_v55 }
 0x356   :  { %v3878_v0 = vadd.f32 %v511_v63, %v3863_v53  ;;  %3130 = vmatpush3.msra.mxu1 %v628_v3  ;;  %v627_v53 = vld [vmem:[#allocation5 + $0x590] sm:$0xff]  ;;  %3140 = vmatpush3.msra.mxu0 %v756_v55 }
 0x357   :  { %3131 = vmatprep.subr.mxu1 %v627_v53  ;;  %3141 = vmatprep.subr.mxu0 %v755_v4 }
 0x358   :  { %3098 = vmatprep.mubr.f32.mxu0 %v3878_v0  ;;  %3132 = vmatpush3.msra.mxu1 %v627_v53 }
 0x359   :  { %3099 = vmatmul.mubr.f32.gmra.mxu0 %v3881_v1  ;;  %3177 = vmatprep.subr.mxu1 %v866_v36 }
 0x35a   :  { %3142 = vmatpush3.msra.mxu0 %v755_v4 }
 0x35b   :  { %3143 = vmatprep.subr.mxu0 %v754_v5 }
 0x35c   :  { %3144 = vmatpush3.msra.mxu0 %v754_v5 }
 0x35d   :  { %3145 = vmatprep.subr.mxu0 %v753_v6 }
 0x35e   :  { %3146 = vmatpush3.msra.mxu0 %v753_v6 }
 0x35f   :  { %3147 = vmatprep.subr.mxu0 %v752_v7 }
 0x360   :  { %3148 = vmatpush3.msra.mxu0 %v752_v7 }
 0x361   :  { %3149 = vmatprep.subr.mxu0 %v751_v8 }
 0x362   :  { %3150 = vmatpush3.msra.mxu0 %v751_v8  ;;  %v855_v8 = vld [vmem:[#allocation5 + $0x7f0] sm:$0xff] }
 0x363   :  { %3151 = vmatprep.subr.mxu0 %v750_v9 }
 0x364   :  { %3152 = vmatpush3.msra.mxu0 %v750_v9  ;;  %v852_v9 = vld [vmem:[#allocation5 + $0x7c0] sm:$0xff] }
 0x365   :  { %3153 = vmatprep.subr.mxu0 %v749_v10 }
 0x366   :  { %3154 = vmatpush3.msra.mxu0 %v749_v10  ;;  %v851_v10 = vld [vmem:[#allocation5 + $0x7b0] sm:$0xff] }
 0x367   :  { %3155 = vmatprep.subr.mxu0 %v748_v11 }
 0x368   :  { %3156 = vmatpush3.msra.mxu0 %v748_v11  ;;  %v975_v11 = vld [vmem:[#allocation5 + $0x9a0] sm:$0xff] }
 0x369   :  { %3157 = vmatprep.subr.mxu0 %v747_v12 }
 0x36a   :  { %3158 = vmatpush3.msra.mxu0 %v747_v12  ;;  %v973_v12 = vld [vmem:[#allocation5 + $0x980] sm:$0xff] }
 0x36b   :  { %3159 = vmatprep.subr.mxu0 %v746_v30 }
 0x36c   :  { %3160 = vmatpush3.msra.mxu0 %v746_v30 }
 0x36d   :  { %3161 = vmatprep.subr.mxu0 %v745_v31 }
 0x36e   :  { %3162 = vmatpush3.msra.mxu0 %v745_v31 }
 0x36f   :  { %3163 = vmatprep.subr.mxu0 %v744_v32 }
 0x370   :  { %3164 = vmatpush3.msra.mxu0 %v744_v32 }
 0x371   :  { %3165 = vmatprep.subr.mxu0 %v743_v33 }
 0x372   :  { %3166 = vmatpush3.msra.mxu0 %v743_v33 }
 0x373   :  { %3167 = vmatprep.subr.mxu0 %v742_v34 }
 0x374   :  { %3168 = vmatpush3.msra.mxu0 %v742_v34 }
 0x375   :  { %3169 = vmatprep.subr.mxu0 %v741_v35 }
 0x376   :  { %3170 = vmatpush3.msra.mxu0 %v741_v35 }
 0x411   :  { %v3097_v14 = vpop.f32.mrf.mxu0 }
 0x412   :  { %v606_v15 = vadd.f32 %v3097_v14, %v533_v13  ;;  %v971_v14 = vld [vmem:[#allocation5 + $0x960] sm:$0xff] }
 0x413   :  { %v600_v16 = vpop.f32.mrf.mxu0 }
 0x414   :  { %v601_v17 = vadd.f32 %v600_v16, %v533_v13  ;;  %v620_v18 = vmul.f32 0.01, %v606_v15  ;;  %v969_v16 = vld [vmem:[#allocation5 + $0x940] sm:$0xff] }
 0x416   :  { %v619_v19 = vmul.f32 0.01, %v601_v17  ;;  %v624_v21 = vmax.f32 %v606_v15, %v620_v18  ;;  %v970_v15 = vld [vmem:[#allocation5 + $0x950] sm:$0xff]  ;;  %v967_v18 = vld [vmem:[#allocation5 + $0x920] sm:$0xff] }
 0x418   :  { %v623_v20 = vmax.f32 %v601_v17, %v619_v19  ;;  %v968_v17 = vld [vmem:[#allocation5 + $0x930] sm:$0xff] }
 0x419   :  { %v3100_v22 = vpop.f32.mrf.mxu0  ;;  %v966_v19 = vld [vmem:[#allocation5 + $0x910] sm:$0xff] }
 0x41a   :  { %v616_v23 = vadd.f32 %v3100_v22, %v533_v13  ;;  %3133 = vmatprep.mubr.f32.mxu1 %v623_v20  ;;  %v757_v20 = vld [vmem:[#allocation5 + $0x7a0] ss:$0 sm:$0xff] }
 0x41b   :  { %v610_v24 = vpop.f32.mrf.mxu0  ;;  %3134 = vmatmul.mubr.f32.vlgmr.msra.gmra.mxu1 %v624_v21 }
 0x41c   :  { %v611_v25 = vadd.f32 %v610_v24, %v533_v13  ;;  %v622_v26 = vmul.f32 0.01, %v616_v23  ;;  %3178 = vmatpush3.msra.mxu1 %v866_v36  ;;  %v972_v13 = vld [vmem:[#allocation5 + $0x970] sm:$0xff] }
 0x41d   :  { %3179 = vmatprep.subr.mxu1 %v865_v37 }
 0x41e   :  { %v621_v27 = vmul.f32 0.01, %v611_v25  ;;  %v626_v29 = vmax.f32 %v616_v23, %v622_v26  ;;  %3180 = vmatpush3.msra.mxu1 %v865_v37  ;;  %v965_v37 = vld [vmem:[#allocation5 + $0x900] sm:$0xff] }
 0x41f   :  { %3181 = vmatprep.subr.mxu1 %v864_v38 }
 0x420   :  { %v625_v28 = vmax.f32 %v611_v25, %v621_v27  ;;  %3182 = vmatpush3.msra.mxu1 %v864_v38  ;;  %v964_v38 = vld [vmem:[#allocation5 + $0x8f0] sm:$0xff] }
 0x421   :  { %3183 = vmatprep.subr.mxu1 %v863_v39 }
 0x422   :  { %3136 = vmatprep.mubr.f32.mxu1 %v625_v28  ;;  %3184 = vmatpush3.msra.mxu1 %v863_v39  ;;  %v963_v39 = vld [vmem:[#allocation5 + $0x8e0] sm:$0xff] }
 0x423   :  { %3137 = vmatmul.mubr.f32.gmra.mxu1 %v626_v29  ;;  %3185 = vmatprep.subr.mxu1 %v862_v40 }
 0x424   :  { %3186 = vmatpush3.msra.mxu1 %v862_v40  ;;  %v962_v40 = vld [vmem:[#allocation5 + $0x8d0] sm:$0xff] }
 0x425   :  { %3187 = vmatprep.subr.mxu1 %v861_v41 }
 0x426   :  { %3188 = vmatpush3.msra.mxu1 %v861_v41  ;;  %v961_v41 = vld [vmem:[#allocation5 + $0x8c0] sm:$0xff] }
 0x427   :  { %3189 = vmatprep.subr.mxu1 %v860_v43 }
 0x428   :  { %3190 = vmatpush3.msra.mxu1 %v860_v43  ;;  %v1090_v43 = vld [vmem:[#allocation5 + $0xac0] sm:$0xff] }
 0x429   :  { %3191 = vmatprep.subr.mxu1 %v859_v44 }
 0x42a   :  { %3192 = vmatpush3.msra.mxu1 %v859_v44  ;;  %v1089_v44 = vld [vmem:[#allocation5 + $0xab0] sm:$0xff] }
 0x42b   :  { %3193 = vmatprep.subr.mxu1 %v858_v45 }
 0x42c   :  { %3194 = vmatpush3.msra.mxu1 %v858_v45  ;;  %v1088_v45 = vld [vmem:[#allocation5 + $0xaa0] sm:$0xff] }
 0x42d   :  { %3195 = vmatprep.subr.mxu1 %v857_v46 }
 0x42e   :  { %3196 = vmatpush3.msra.mxu1 %v857_v46  ;;  %v1087_v46 = vld [vmem:[#allocation5 + $0xa90] sm:$0xff] }
 0x42f   :  { %3197 = vmatprep.subr.mxu1 %v856_v48 }
 0x430   :  { %3198 = vmatpush3.msra.mxu1 %v856_v48  ;;  %v1086_v48 = vld [vmem:[#allocation5 + $0xa80] sm:$0xff] }
 0x431   :  { %3199 = vmatprep.subr.mxu1 %v855_v8 }
 0x432   :  { %3200 = vmatpush3.msra.mxu1 %v855_v8 }
 0x4db   :  { %v3135_v50 = vpop.f32.mrf.mxu1 }
 0x4dc   :  { %v716_v51 = vadd.f32 %v3135_v50, %v643_v49  ;;  %v1084_v50 = vld [vmem:[#allocation5 + $0xa60] sm:$0xff] }
 0x4dd   :  { %v710_v52 = vpop.f32.mrf.mxu1 }
 0x4de   :  { %v730_v54 = vmul.f32 0.01, %v716_v51  ;;  %v711_v58 = vadd.f32 %v710_v52, %v643_v49  ;;  %v1082_v52 = vld [vmem:[#allocation5 + $0xa40] sm:$0xff] }
 0x4e0   :  { %v729_v59 = vmul.f32 0.01, %v711_v58  ;;  %v734_v60 = vmax.f32 %v716_v51, %v730_v54  ;;  %v1083_v51 = vld [vmem:[#allocation5 + $0xa50] sm:$0xff] }
 0x4e1   :  { %v1081_v54 = vld [vmem:[#allocation5 + $0xa30] sm:$0xff] }
 0x4e2   :  { %v733_v61 = vmax.f32 %v711_v58, %v729_v59  ;;  %v738_v47 = vadd.f32 %v734_v60, %v3873_v57  ;;  %v853_v57 = vld [vmem:[#allocation5 + $0x7d0] sm:$0xff] }
 0x4e3   :  { %v3138_v62 = vpop.f32.mrf.mxu1  ;;  %v867_v58 = vld [vmem:[#allocation5 + $0x8b0] ss:$0 sm:$0xff] }
 0x4e4   :  { %v726_v63 = vadd.f32 %v3138_v62, %v643_v49  ;;  %v737_v42 = vadd.f32 %v733_v61, %v3870_v56  ;;  %v854_v56 = vld [vmem:[#allocation5 + $0x7e0] sm:$0xff] }
 0x4e5   :  { %v720_v2 = vpop.f32.mrf.mxu1  ;;  %3201 = vmatprep.subr.mxu1 %v854_v56 }
 0x4e6   :  { %v732_v3 = vmul.f32 0.01, %v726_v63  ;;  %v721_v53 = vadd.f32 %v720_v2, %v643_v49  ;;  %3171 = vmatprep.mubr.f32.mxu0 %v737_v42  ;;  %3202 = vmatpush3.msra.mxu1 %v854_v56  ;;  %v1085_v49 = vld [vmem:[#allocation5 + $0xa70] sm:$0xff]  ;;  %v1080_v56 = vld [vmem:[#allocation5 + $0xa20] sm:$0xff] }
 0x4e7   :  { %3172 = vmatmul.mubr.f32.vlgmr.msra.gmra.mxu0 %v738_v47  ;;  %3203 = vmatprep.subr.mxu1 %v853_v57 }
 0x4e8   :  { %v731_v55 = vmul.f32 0.01, %v721_v53  ;;  %v736_v4 = vmax.f32 %v726_v63, %v732_v3  ;;  %3204 = vmatpush3.msra.mxu1 %v853_v57  ;;  %v1079_v57 = vld [vmem:[#allocation5 + $0xa10] sm:$0xff] }
 0x4e9   :  { %3205 = vmatprep.subr.mxu1 %v852_v9 }
 0x4ea   :  { %v735_v5 = vmax.f32 %v721_v53, %v731_v55  ;;  %v740_v7 = vadd.f32 %v736_v4, %v3881_v1  ;;  %3206 = vmatpush3.msra.mxu1 %v852_v9  ;;  %v974_v1 = vld [vmem:[#allocation5 + $0x990] sm:$0xff]  ;;  %v1078_v9 = vld [vmem:[#allocation5 + $0xa00] sm:$0xff] }
 0x4eb   :  { %3207 = vmatprep.subr.mxu1 %v851_v10 }
 0x4ec   :  { %v739_v6 = vadd.f32 %v735_v5, %v3878_v0  ;;  %3208 = vmatpush3.msra.mxu1 %v851_v10  ;;  %v976_v0 = vld [vmem:[#allocation5 + $0x9b0] sm:$0xff] }
 0x4ed   :  { %3215 = vmatprep.subr.mxu0 %v976_v0  ;;  %3253 = vmatprep.subr.mxu1 %v1090_v43  ;;  %v1077_v10 = vld [vmem:[#allocation5 + $0x9f0] sm:$0xff] }
 0x4ee   :  { %3174 = vmatprep.mubr.f32.mxu0 %v739_v6  ;;  %3216 = vmatpush3.msra.mxu0 %v976_v0  ;;  %v1076_v0 = vld [vmem:[#allocation5 + $0x9e0] sm:$0xff] }
 0x4ef   :  { %3175 = vmatmul.mubr.f32.gmra.mxu0 %v740_v7  ;;  %3217 = vmatprep.subr.mxu0 %v975_v11 }
 0x4f0   :  { %3218 = vmatpush3.msra.mxu0 %v975_v11  ;;  %v1075_v11 = vld [vmem:[#allocation5 + $0x9d0] sm:$0xff] }
 0x4f1   :  { %3219 = vmatprep.subr.mxu0 %v974_v1 }
 0x4f2   :  { %3220 = vmatpush3.msra.mxu0 %v974_v1  ;;  %v1200_v1 = vld [vmem:[#allocation5 + $0xbd0] sm:$0xff] }
 0x4f3   :  { %3221 = vmatprep.subr.mxu0 %v973_v12 }
 0x4f4   :  { %3222 = vmatpush3.msra.mxu0 %v973_v12  ;;  %v1199_v12 = vld [vmem:[#allocation5 + $0xbc0] sm:$0xff] }
 0x4f5   :  { %3223 = vmatprep.subr.mxu0 %v972_v13 }
 0x4f6   :  { %3224 = vmatpush3.msra.mxu0 %v972_v13  ;;  %v1198_v13 = vld [vmem:[#allocation5 + $0xbb0] sm:$0xff] }
 0x4f7   :  { %3225 = vmatprep.subr.mxu0 %v971_v14 }
 0x4f8   :  { %3226 = vmatpush3.msra.mxu0 %v971_v14  ;;  %v1197_v14 = vld [vmem:[#allocation5 + $0xba0] sm:$0xff] }
 0x4f9   :  { %3227 = vmatprep.subr.mxu0 %v970_v15 }
 0x4fa   :  { %3228 = vmatpush3.msra.mxu0 %v970_v15  ;;  %v1196_v15 = vld [vmem:[#allocation5 + $0xb90] sm:$0xff] }
 0x4fb   :  { %3229 = vmatprep.subr.mxu0 %v969_v16 }
 0x4fc   :  { %3230 = vmatpush3.msra.mxu0 %v969_v16  ;;  %v1195_v16 = vld [vmem:[#allocation5 + $0xb80] sm:$0xff] }
 0x4fd   :  { %3231 = vmatprep.subr.mxu0 %v968_v17 }
 0x4fe   :  { %3232 = vmatpush3.msra.mxu0 %v968_v17  ;;  %v1194_v17 = vld [vmem:[#allocation5 + $0xb70] sm:$0xff] }
 0x4ff   :  { %3233 = vmatprep.subr.mxu0 %v967_v18 }
 0x500   :  { %3234 = vmatpush3.msra.mxu0 %v967_v18  ;;  %v1193_v18 = vld [vmem:[#allocation5 + $0xb60] sm:$0xff] }
 0x501   :  { %3235 = vmatprep.subr.mxu0 %v966_v19 }
 0x502   :  { %3236 = vmatpush3.msra.mxu0 %v966_v19  ;;  %v1192_v19 = vld [vmem:[#allocation5 + $0xb50] sm:$0xff] }
 0x503   :  { %3237 = vmatprep.subr.mxu0 %v965_v37 }
 0x504   :  { %3238 = vmatpush3.msra.mxu0 %v965_v37 }
 0x505   :  { %3239 = vmatprep.subr.mxu0 %v964_v38 }
 0x506   :  { %3240 = vmatpush3.msra.mxu0 %v964_v38 }
 0x507   :  { %3241 = vmatprep.subr.mxu0 %v963_v39 }
 0x508   :  { %3242 = vmatpush3.msra.mxu0 %v963_v39 }
 0x509   :  { %3243 = vmatprep.subr.mxu0 %v962_v40 }
 0x50a   :  { %3244 = vmatpush3.msra.mxu0 %v962_v40 }
 0x50b   :  { %3245 = vmatprep.subr.mxu0 %v961_v41 }
 0x50c   :  { %3246 = vmatpush3.msra.mxu0 %v961_v41 }
 0x50d   :  { %3291 = vmatprep.subr.mxu0 %v1200_v1 }
 0x5a7   :  { %v3173_v21 = vpop.f32.mrf.mxu0 }
 0x5a8   :  { %v830_v22 = vadd.f32 %v3173_v21, %v757_v20  ;;  %v1190_v21 = vld [vmem:[#allocation5 + $0xb30] sm:$0xff] }
 0x5a9   :  { %v824_v23 = vpop.f32.mrf.mxu0 }
 0x5aa   :  { %v825_v24 = vadd.f32 %v824_v23, %v757_v20  ;;  %v844_v25 = vmul.f32 0.01, %v830_v22 }
 0x5ac   :  { %v843_v26 = vmul.f32 0.01, %v825_v24  ;;  %v3891_v28 = vmax.f32 %v830_v22, %v844_v25  ;;  %v977_v22 = vld [vmem:[#allocation5 + $0x9c0] ss:$0 sm:$0xff] }
 0x5ae   :  { %v3889_v27 = vmax.f32 %v825_v24, %v843_v26 }
 0x5af   :  { %v3176_v29 = vpop.f32.mrf.mxu0 }
 0x5b0   :  { %v840_v30 = vadd.f32 %v3176_v29, %v757_v20  ;;  %3209 = vmatprep.mubr.f32.mxu1 %v3889_v27 }
 0x5b1   :  { %v834_v31 = vpop.f32.mrf.mxu0  ;;  %3210 = vmatmul.mubr.f32.vlgmr.msra.gmra.mxu1 %v3891_v28 }
 0x5b2   :  { %v835_v32 = vadd.f32 %v834_v31, %v757_v20  ;;  %v846_v33 = vmul.f32 0.01, %v840_v30  ;;  %3254 = vmatpush3.msra.mxu1 %v1090_v43  ;;  %v1191_v20 = vld [vmem:[#allocation5 + $0xb40] sm:$0xff] }
 0x5b3   :  { %3255 = vmatprep.subr.mxu1 %v1089_v44 }
 0x5b4   :  { %v845_v34 = vmul.f32 0.01, %v835_v32  ;;  %v3897_v36 = vmax.f32 %v840_v30, %v846_v33  ;;  %3256 = vmatpush3.msra.mxu1 %v1089_v44 }
 0x5b5   :  { %3257 = vmatprep.subr.mxu1 %v1088_v45 }
 0x5b6   :  { %v3895_v35 = vmax.f32 %v835_v32, %v845_v34  ;;  %3258 = vmatpush3.msra.mxu1 %v1088_v45 }
 0x5b7   :  { %3259 = vmatprep.subr.mxu1 %v1087_v46 }
 0x5b8   :  { %3212 = vmatprep.mubr.f32.mxu1 %v3895_v35  ;;  %3260 = vmatpush3.msra.mxu1 %v1087_v46 }
 0x5b9   :  { %3213 = vmatmul.mubr.f32.gmra.mxu1 %v3897_v36  ;;  %3261 = vmatprep.subr.mxu1 %v1086_v48 }
 0x5ba   :  { %3262 = vmatpush3.msra.mxu1 %v1086_v48 }
 0x5bb   :  { %3263 = vmatprep.subr.mxu1 %v1085_v49 }
 0x5bc   :  { %3264 = vmatpush3.msra.mxu1 %v1085_v49  ;;  %v1187_v49 = vld [vmem:[#allocation5 + $0xb00] sm:$0xff] }
 0x5bd   :  { %3265 = vmatprep.subr.mxu1 %v1084_v50 }
 0x5be   :  { %3266 = vmatpush3.msra.mxu1 %v1084_v50  ;;  %v1186_v50 = vld [vmem:[#allocation5 + $0xaf0] sm:$0xff] }
 0x5bf   :  { %3267 = vmatprep.subr.mxu1 %v1083_v51 }
 0x5c0   :  { %3268 = vmatpush3.msra.mxu1 %v1083_v51  ;;  %v1313_v51 = vld [vmem:[#allocation5 + $0xcd0] sm:$0xff] }
 0x5c1   :  { %3269 = vmatprep.subr.mxu1 %v1082_v52 }
 0x5c2   :  { %3270 = vmatpush3.msra.mxu1 %v1082_v52  ;;  %v1312_v52 = vld [vmem:[#allocation5 + $0xcc0] sm:$0xff] }
 0x5c3   :  { %3271 = vmatprep.subr.mxu1 %v1081_v54 }
 0x5c4   :  { %3272 = vmatpush3.msra.mxu1 %v1081_v54  ;;  %v1311_v54 = vld [vmem:[#allocation5 + $0xcb0] sm:$0xff] }
 0x5c5   :  { %3273 = vmatprep.subr.mxu1 %v1080_v56 }
 0x5c6   :  { %3274 = vmatpush3.msra.mxu1 %v1080_v56 }
 0x5c7   :  { %3275 = vmatprep.subr.mxu1 %v1079_v57 }
 0x5c8   :  { %3276 = vmatpush3.msra.mxu1 %v1079_v57 }
 0x5c9   :  { %3277 = vmatprep.subr.mxu1 %v1078_v9 }
 0x5ca   :  { %3278 = vmatpush3.msra.mxu1 %v1078_v9 }
 0x5cb   :  { %3279 = vmatprep.subr.mxu1 %v1077_v10 }
 0x5cc   :  { %3280 = vmatpush3.msra.mxu1 %v1077_v10 }
 0x5cd   :  { %3281 = vmatprep.subr.mxu1 %v1076_v0 }
 0x5ce   :  { %3282 = vmatpush3.msra.mxu1 %v1076_v0 }
 0x5cf   :  { %3283 = vmatprep.subr.mxu1 %v1075_v11 }
 0x5d0   :  { %3284 = vmatpush3.msra.mxu1 %v1075_v11 }
 0x671   :  { %v3211_v59 = vpop.f32.mrf.mxu1 }
 0x672   :  { %v940_v60 = vadd.f32 %v3211_v59, %v867_v58  ;;  %v1309_v59 = vld [vmem:[#allocation5 + $0xc90] sm:$0xff] }
 0x673   :  { %v934_v61 = vpop.f32.mrf.mxu1 }
 0x674   :  { %v935_v62 = vadd.f32 %v934_v61, %v867_v58  ;;  %v954_v63 = vmul.f32 0.01, %v940_v60  ;;  %v1307_v61 = vld [vmem:[#allocation5 + $0xc70] sm:$0xff] }
 0x676   :  { %v953_v42 = vmul.f32 0.01, %v935_v62  ;;  %v958_v2 = vmax.f32 %v940_v60, %v954_v63  ;;  %v1308_v60 = vld [vmem:[#allocation5 + $0xc80] sm:$0xff]  ;;  %v1305_v63 = vld [vmem:[#allocation5 + $0xc50] sm:$0xff] }
 0x678   :  { %v957_v47 = vmax.f32 %v935_v62, %v953_v42  ;;  %v1306_v62 = vld [vmem:[#allocation5 + $0xc60] sm:$0xff]  ;;  %v1091_v42 = vld [vmem:[#allocation5 + $0xad0] ss:$0 sm:$0xff] }
 0x679   :  { %v3214_v3 = vpop.f32.mrf.mxu1 }
 0x67a   :  { %v950_v53 = vadd.f32 %v3214_v3, %v867_v58  ;;  %3247 = vmatprep.mubr.f32.mxu0 %v957_v47 }
 0x67b   :  { %v944_v55 = vpop.f32.mrf.mxu1  ;;  %3248 = vmatmul.mubr.f32.vlgmr.msra.gmra.mxu0 %v958_v2 }
 0x67c   :  { %v945_v4 = vadd.f32 %v944_v55, %v867_v58  ;;  %v956_v5 = vmul.f32 0.01, %v950_v53  ;;  %3292 = vmatpush3.msra.mxu0 %v1200_v1  ;;  %v1310_v58 = vld [vmem:[#allocation5 + $0xca0] sm:$0xff] }
 0x67d   :  { %3293 = vmatprep.subr.mxu0 %v1199_v12  ;;  %v1304_v1 = vld [vmem:[#allocation5 + $0xc40] sm:$0xff] }
 0x67e   :  { %v955_v6 = vmul.f32 0.01, %v945_v4  ;;  %v960_v8 = vmax.f32 %v950_v53, %v956_v5  ;;  %3294 = vmatpush3.msra.mxu0 %v1199_v12  ;;  %v1303_v12 = vld [vmem:[#allocation5 + $0xc30] sm:$0xff] }
 0x67f   :  { %3295 = vmatprep.subr.mxu0 %v1198_v13 }
 0x680   :  { %v959_v7 = vmax.f32 %v945_v4, %v955_v6  ;;  %3296 = vmatpush3.msra.mxu0 %v1198_v13  ;;  %v1302_v13 = vld [vmem:[#allocation5 + $0xc20] sm:$0xff] }
 0x681   :  { %3297 = vmatprep.subr.mxu0 %v1197_v14 }
 0x682   :  { %3250 = vmatprep.mubr.f32.mxu0 %v959_v7  ;;  %3298 = vmatpush3.msra.mxu0 %v1197_v14  ;;  %v1301_v14 = vld [vmem:[#allocation5 + $0xc10] sm:$0xff] }
 0x683   :  { %3251 = vmatmul.mubr.f32.gmra.mxu0 %v960_v8  ;;  %3299 = vmatprep.subr.mxu0 %v1196_v15 }
 0x684   :  { %3300 = vmatpush3.msra.mxu0 %v1196_v15  ;;  %v1300_v15 = vld [vmem:[#allocation5 + $0xc00] sm:$0xff] }
 0x685   :  { %3301 = vmatprep.subr.mxu0 %v1195_v16 }
 0x686   :  { %3302 = vmatpush3.msra.mxu0 %v1195_v16  ;;  %v1299_v16 = vld [vmem:[#allocation5 + $0xbf0] sm:$0xff] }
 0x687   :  { %3303 = vmatprep.subr.mxu0 %v1194_v17 }
 0x688   :  { %3304 = vmatpush3.msra.mxu0 %v1194_v17  ;;  %v1424_v17 = vld [vmem:[#allocation5 + $0xdf0] sm:$0xff] }
 0x689   :  { %3305 = vmatprep.subr.mxu0 %v1193_v18 }
 0x68a   :  { %3306 = vmatpush3.msra.mxu0 %v1193_v18  ;;  %v1423_v18 = vld [vmem:[#allocation5 + $0xde0] sm:$0xff] }
 0x68b   :  { %3307 = vmatprep.subr.mxu0 %v1192_v19 }
 0x68c   :  { %3308 = vmatpush3.msra.mxu0 %v1192_v19  ;;  %v1422_v19 = vld [vmem:[#allocation5 + $0xdd0] sm:$0xff] }
 0x68d   :  { %3309 = vmatprep.subr.mxu0 %v1191_v20 }
 0x68e   :  { %3310 = vmatpush3.msra.mxu0 %v1191_v20  ;;  %v1421_v20 = vld [vmem:[#allocation5 + $0xdc0] sm:$0xff] }
 0x68f   :  { %3311 = vmatprep.subr.mxu0 %v1190_v21 }
 0x690   :  { %3312 = vmatpush3.msra.mxu0 %v1190_v21  ;;  %v1420_v21 = vld [vmem:[#allocation5 + $0xdb0] sm:$0xff] }
 0x73b   :  { %v3249_v23 = vpop.f32.mrf.mxu0 }
 0x73c   :  { %v1050_v24 = vadd.f32 %v3249_v23, %v977_v22  ;;  %v1418_v23 = vld [vmem:[#allocation5 + $0xd90] sm:$0xff] }
 0x73d   :  { %v1044_v25 = vpop.f32.mrf.mxu0 }
 0x73e   :  { %v1064_v26 = vmul.f32 0.01, %v1050_v24  ;;  %v1045_v29 = vadd.f32 %v1044_v25, %v977_v22  ;;  %v1416_v25 = vld [vmem:[#allocation5 + $0xd70] sm:$0xff] }
 0x740   :  { %v1063_v30 = vmul.f32 0.01, %v1045_v29  ;;  %v1068_v31 = vmax.f32 %v1050_v24, %v1064_v26  ;;  %v1417_v24 = vld [vmem:[#allocation5 + $0xd80] sm:$0xff] }
 0x741   :  { %v1415_v26 = vld [vmem:[#allocation5 + $0xd60] sm:$0xff] }
 0x742   :  { %v1067_v32 = vmax.f32 %v1045_v29, %v1063_v30  ;;  %v3905_v38 = vadd.f32 %v1068_v31, %v3891_v28  ;;  %v1188_v28 = vld [vmem:[#allocation5 + $0xb10] sm:$0xff]  ;;  %v1201_v30 = vld [vmem:[#allocation5 + $0xbe0] ss:$0 sm:$0xff] }
 0x743   :  { %v3252_v33 = vpop.f32.mrf.mxu0  ;;  %v1414_v29 = vld [vmem:[#allocation5 + $0xd50] sm:$0xff] }
 0x744   :  { %v1060_v34 = vadd.f32 %v3252_v33, %v977_v22  ;;  %v3902_v37 = vadd.f32 %v1067_v32, %v3889_v27  ;;  %v1189_v27 = vld [vmem:[#allocation5 + $0xb20] sm:$0xff] }
 0x745   :  { %v1054_v39 = vpop.f32.mrf.mxu0  ;;  %3313 = vmatprep.subr.mxu0 %v1189_v27 }
 0x746   :  { %v1066_v40 = vmul.f32 0.01, %v1060_v34  ;;  %v1055_v41 = vadd.f32 %v1054_v39, %v977_v22  ;;  %3285 = vmatprep.mubr.f32.mxu1 %v3902_v37  ;;  %3314 = vmatpush3.msra.mxu0 %v1189_v27  ;;  %v1419_v22 = vld [vmem:[#allocation5 + $0xda0] sm:$0xff] }
 0x747   :  { %3286 = vmatmul.mubr.f32.vlgmr.msra.gmra.mxu1 %v3905_v38  ;;  %3315 = vmatprep.subr.mxu0 %v1188_v28 }
 0x748   :  { %v1065_v43 = vmul.f32 0.01, %v1055_v41  ;;  %v1070_v44 = vmax.f32 %v1060_v34, %v1066_v40  ;;  %3316 = vmatpush3.msra.mxu0 %v1188_v28 }
 0x749   :  { %3317 = vmatprep.subr.mxu0 %v1187_v49 }
 0x74a   :  { %v1069_v45 = vmax.f32 %v1055_v41, %v1065_v43  ;;  %v3913_v48 = vadd.f32 %v1070_v44, %v3897_v36  ;;  %3318 = vmatpush3.msra.mxu0 %v1187_v49  ;;  %v1314_v36 = vld [vmem:[#allocation5 + $0xce0] sm:$0xff] }
 0x74b   :  { %3319 = vmatprep.subr.mxu0 %v1186_v50  ;;  %3329 = vmatprep.subr.mxu1 %v1314_v36 }
 0x74c   :  { %v3910_v46 = vadd.f32 %v1069_v45, %v3895_v35  ;;  %3320 = vmatpush3.msra.mxu0 %v1186_v50  ;;  %v1185_v35 = vld [vmem:[#allocation5 + $0xae0] sm:$0xff]  ;;  %3330 = vmatpush3.msra.mxu1 %v1314_v36 }
 0x74d   :  { %3321 = vmatprep.subr.mxu0 %v1185_v35  ;;  %3331 = vmatprep.subr.mxu1 %v1313_v51 }
 0x74e   :  { %3288 = vmatprep.mubr.f32.mxu1 %v3910_v46  ;;  %3322 = vmatpush3.msra.mxu0 %v1185_v35 }
 0x74f   :  { %3289 = vmatmul.mubr.f32.gmra.mxu1 %v3913_v48  ;;  %3367 = vmatprep.subr.mxu0 %v1424_v17 }
 0x750   :  { %3332 = vmatpush3.msra.mxu1 %v1313_v51 }
 0x751   :  { %3333 = vmatprep.subr.mxu1 %v1312_v52 }
 0x752   :  { %3334 = vmatpush3.msra.mxu1 %v1312_v52 }
 0x753   :  { %3335 = vmatprep.subr.mxu1 %v1311_v54 }
 0x754   :  { %3336 = vmatpush3.msra.mxu1 %v1311_v54 }
 0x755   :  { %3337 = vmatprep.subr.mxu1 %v1310_v58 }
 0x756   :  { %3338 = vmatpush3.msra.mxu1 %v1310_v58 }
 0x757   :  { %3339 = vmatprep.subr.mxu1 %v1309_v59 }
 0x758   :  { %3340 = vmatpush3.msra.mxu1 %v1309_v59  ;;  %v1413_v59 = vld [vmem:[#allocation5 + $0xd40] sm:$0xff] }
 0x759   :  { %3341 = vmatprep.subr.mxu1 %v1308_v60 }
 0x75a   :  { %3342 = vmatpush3.msra.mxu1 %v1308_v60  ;;  %v1410_v60 = vld [vmem:[#allocation5 + $0xd10] sm:$0xff] }
 0x75b   :  { %3343 = vmatprep.subr.mxu1 %v1307_v61 }
 0x75c   :  { %3344 = vmatpush3.msra.mxu1 %v1307_v61  ;;  %v1409_v61 = vld [vmem:[#allocation5 + $0xd00] sm:$0xff] }
 0x75d   :  { %3345 = vmatprep.subr.mxu1 %v1306_v62 }
 0x75e   :  { %3346 = vmatpush3.msra.mxu1 %v1306_v62  ;;  %v1533_v62 = vld [vmem:[#allocation5 + $0xef0] sm:$0xff] }
 0x75f   :  { %3347 = vmatprep.subr.mxu1 %v1305_v63 }
 0x760   :  { %3348 = vmatpush3.msra.mxu1 %v1305_v63  ;;  %v1531_v63 = vld [vmem:[#allocation5 + $0xed0] sm:$0xff] }
 0x761   :  { %3349 = vmatprep.subr.mxu1 %v1304_v1 }
 0x762   :  { %3350 = vmatpush3.msra.mxu1 %v1304_v1 }
 0x763   :  { %3351 = vmatprep.subr.mxu1 %v1303_v12 }
 0x764   :  { %3352 = vmatpush3.msra.mxu1 %v1303_v12 }
 0x765   :  { %3353 = vmatprep.subr.mxu1 %v1302_v13 }
 0x766   :  { %3354 = vmatpush3.msra.mxu1 %v1302_v13 }
 0x767   :  { %3355 = vmatprep.subr.mxu1 %v1301_v14 }
 0x768   :  { %3356 = vmatpush3.msra.mxu1 %v1301_v14 }
 0x769   :  { %3357 = vmatprep.subr.mxu1 %v1300_v15 }
 0x76a   :  { %3358 = vmatpush3.msra.mxu1 %v1300_v15 }
 0x76b   :  { %3359 = vmatprep.subr.mxu1 %v1299_v16 }
 0x76c   :  { %3360 = vmatpush3.msra.mxu1 %v1299_v16 }
 0x807   :  { %v3287_v47 = vpop.f32.mrf.mxu1 }
 0x808   :  { %v1164_v2 = vadd.f32 %v3287_v47, %v1091_v42  ;;  %v1529_v47 = vld [vmem:[#allocation5 + $0xeb0] sm:$0xff] }
 0x809   :  { %v1158_v3 = vpop.f32.mrf.mxu1 }
 0x80a   :  { %v1159_v53 = vadd.f32 %v1158_v3, %v1091_v42  ;;  %v1178_v55 = vmul.f32 0.01, %v1164_v2  ;;  %v1527_v3 = vld [vmem:[#allocation5 + $0xe90] sm:$0xff] }
 0x80c   :  { %v1177_v4 = vmul.f32 0.01, %v1159_v53  ;;  %v1182_v6 = vmax.f32 %v1164_v2, %v1178_v55  ;;  %v1528_v2 = vld [vmem:[#allocation5 + $0xea0] sm:$0xff]  ;;  %v1525_v55 = vld [vmem:[#allocation5 + $0xe70] sm:$0xff] }
 0x80e   :  { %v1181_v5 = vmax.f32 %v1159_v53, %v1177_v4  ;;  %v1526_v53 = vld [vmem:[#allocation5 + $0xe80] sm:$0xff] }
 0x80f   :  { %v3290_v7 = vpop.f32.mrf.mxu1  ;;  %v1524_v4 = vld [vmem:[#allocation5 + $0xe60] sm:$0xff] }
 0x810   :  { %v1174_v8 = vadd.f32 %v3290_v7, %v1091_v42  ;;  %3323 = vmatprep.mubr.f32.mxu0 %v1181_v5  ;;  %v1315_v5 = vld [vmem:[#allocation5 + $0xcf0] ss:$0 sm:$0xff] }
 0x811   :  { %v1168_v56 = vpop.f32.mrf.mxu1  ;;  %3324 = vmatmul.mubr.f32.vlgmr.msra.gmra.mxu0 %v1182_v6 }
 0x812   :  { %v1169_v57 = vadd.f32 %v1168_v56, %v1091_v42  ;;  %v1180_v9 = vmul.f32 0.01, %v1174_v8  ;;  %3368 = vmatpush3.msra.mxu0 %v1424_v17  ;;  %v1530_v42 = vld [vmem:[#allocation5 + $0xec0] sm:$0xff] }
 0x813   :  { %3369 = vmatprep.subr.mxu0 %v1423_v18 }
 0x814   :  { %v1179_v10 = vmul.f32 0.01, %v1169_v57  ;;  %v1184_v11 = vmax.f32 %v1174_v8, %v1180_v9  ;;  %3370 = vmatpush3.msra.mxu0 %v1423_v18  ;;  %v1523_v18 = vld [vmem:[#allocation5 + $0xe50] sm:$0xff] }
 0x815   :  { %3371 = vmatprep.subr.mxu0 %v1422_v19 }
 0x816   :  { %v1183_v0 = vmax.f32 %v1169_v57, %v1179_v10  ;;  %3372 = vmatpush3.msra.mxu0 %v1422_v19  ;;  %v1522_v19 = vld [vmem:[#allocation5 + $0xe40] sm:$0xff] }
 0x817   :  { %3373 = vmatprep.subr.mxu0 %v1421_v20 }
 0x818   :  { %3326 = vmatprep.mubr.f32.mxu0 %v1183_v0  ;;  %3374 = vmatpush3.msra.mxu0 %v1421_v20  ;;  %v1521_v20 = vld [vmem:[#allocation5 + $0xe30] sm:$0xff] }
 0x819   :  { %3327 = vmatmul.mubr.f32.gmra.mxu0 %v1184_v11  ;;  %3375 = vmatprep.subr.mxu0 %v1420_v21 }
 0x81a   :  { %3376 = vmatpush3.msra.mxu0 %v1420_v21  ;;  %v1520_v21 = vld [vmem:[#allocation5 + $0xe20] sm:$0xff] }
 0x81b   :  { %3377 = vmatprep.subr.mxu0 %v1419_v22 }
 0x81c   :  { %3378 = vmatpush3.msra.mxu0 %v1419_v22  ;;  %v1519_v22 = vld [vmem:[#allocation5 + $0xe10] sm:$0xff] }
 0x81d   :  { %3379 = vmatprep.subr.mxu0 %v1418_v23 }
 0x81e   :  { %3380 = vmatpush3.msra.mxu0 %v1418_v23  ;;  %v1648_v23 = vld [vmem:[#allocation5 + $0x1010] sm:$0xff] }
 0x81f   :  { %3381 = vmatprep.subr.mxu0 %v1417_v24 }
 0x820   :  { %3382 = vmatpush3.msra.mxu0 %v1417_v24  ;;  %v1647_v24 = vld [vmem:[#allocation5 + $0x1000] sm:$0xff] }
 0x821   :  { %3383 = vmatprep.subr.mxu0 %v1416_v25 }
 0x822   :  { %3384 = vmatpush3.msra.mxu0 %v1416_v25  ;;  %v1646_v25 = vld [vmem:[#allocation5 + $0xff0] sm:$0xff] }
 0x823   :  { %3385 = vmatprep.subr.mxu0 %v1415_v26 }
 0x824   :  { %3386 = vmatpush3.msra.mxu0 %v1415_v26  ;;  %v1645_v26 = vld [vmem:[#allocation5 + $0xfe0] sm:$0xff] }
 0x825   :  { %3387 = vmatprep.subr.mxu0 %v1414_v29 }
 0x826   :  { %3388 = vmatpush3.msra.mxu0 %v1414_v29  ;;  %v1644_v29 = vld [vmem:[#allocation5 + $0xfd0] sm:$0xff] }
 0x827   :  { %3389 = vmatprep.subr.mxu0 %v1413_v59 }
 0x828   :  { %3390 = vmatpush3.msra.mxu0 %v1413_v59 }
 0x8d1   :  { %v3325_v31 = vpop.f32.mrf.mxu0 }
 0x8d2   :  { %v1274_v32 = vadd.f32 %v3325_v31, %v1201_v30  ;;  %v1642_v31 = vld [vmem:[#allocation5 + $0xfb0] sm:$0xff] }
 0x8d3   :  { %v1268_v33 = vpop.f32.mrf.mxu0 }
 0x8d4   :  { %v1288_v34 = vmul.f32 0.01, %v1274_v32  ;;  %v1269_v39 = vadd.f32 %v1268_v33, %v1201_v30  ;;  %v1640_v33 = vld [vmem:[#allocation5 + $0xf90] sm:$0xff] }
 0x8d6   :  { %v1287_v40 = vmul.f32 0.01, %v1269_v39  ;;  %v1292_v41 = vmax.f32 %v1274_v32, %v1288_v34  ;;  %v1641_v32 = vld [vmem:[#allocation5 + $0xfa0] sm:$0xff] }
 0x8d7   :  { %v1639_v34 = vld [vmem:[#allocation5 + $0xf80] sm:$0xff] }
 0x8d8   :  { %v1291_v43 = vmax.f32 %v1269_v39, %v1287_v40  ;;  %v1296_v28 = vadd.f32 %v1292_v41, %v3905_v38  ;;  %v1411_v38 = vld [vmem:[#allocation5 + $0xd20] sm:$0xff] }
 0x8d9   :  { %v3328_v44 = vpop.f32.mrf.mxu0  ;;  %v1425_v39 = vld [vmem:[#allocation5 + $0xe00] ss:$0 sm:$0xff] }
 0x8da   :  { %v1284_v45 = vadd.f32 %v3328_v44, %v1201_v30  ;;  %v1295_v27 = vadd.f32 %v1291_v43, %v3902_v37  ;;  %v1412_v37 = vld [vmem:[#allocation5 + $0xd30] sm:$0xff] }
 0x8db   :  { %v1278_v49 = vpop.f32.mrf.mxu0  ;;  %3391 = vmatprep.subr.mxu0 %v1412_v37 }
 0x8dc   :  { %v1290_v50 = vmul.f32 0.01, %v1284_v45  ;;  %v1279_v35 = vadd.f32 %v1278_v49, %v1201_v30  ;;  %3361 = vmatprep.mubr.f32.mxu1 %v1295_v27  ;;  %3392 = vmatpush3.msra.mxu0 %v1412_v37  ;;  %v1643_v30 = vld [vmem:[#allocation5 + $0xfc0] sm:$0xff]  ;;  %v1638_v37 = vld [vmem:[#allocation5 + $0xf70] sm:$0xff] }
 0x8dd   :  { %3362 = vmatmul.mubr.f32.vlgmr.msra.gmra.mxu1 %v1296_v28  ;;  %3393 = vmatprep.subr.mxu0 %v1411_v38 }
 0x8de   :  { %v1289_v36 = vmul.f32 0.01, %v1279_v35  ;;  %v1294_v51 = vmax.f32 %v1284_v45, %v1290_v50  ;;  %3394 = vmatpush3.msra.mxu0 %v1411_v38  ;;  %v1637_v38 = vld [vmem:[#allocation5 + $0xf60] sm:$0xff] }
 0x8df   :  { %3395 = vmatprep.subr.mxu0 %v1410_v60 }
 0x8e0   :  { %v1293_v52 = vmax.f32 %v1279_v35, %v1289_v36  ;;  %v1298_v58 = vadd.f32 %v1294_v51, %v3913_v48  ;;  %3396 = vmatpush3.msra.mxu0 %v1410_v60  ;;  %v1532_v48 = vld [vmem:[#allocation5 + $0xee0] sm:$0xff]  ;;  %v1636_v60 = vld [vmem:[#allocation5 + $0xf50] sm:$0xff] }
 0x8e1   :  { %3397 = vmatprep.subr.mxu0 %v1409_v61 }
 0x8e2   :  { %v1297_v54 = vadd.f32 %v1293_v52, %v3910_v46  ;;  %3398 = vmatpush3.msra.mxu0 %v1409_v61  ;;  %v1534_v46 = vld [vmem:[#allocation5 + $0xf00] sm:$0xff] }
 0x8e3   :  { %3405 = vmatprep.subr.mxu1 %v1534_v46  ;;  %3443 = vmatprep.subr.mxu0 %v1648_v23  ;;  %v1635_v61 = vld [vmem:[#allocation5 + $0xf40] sm:$0xff] }
 0x8e4   :  { %3364 = vmatprep.mubr.f32.mxu1 %v1297_v54  ;;  %3406 = vmatpush3.msra.mxu1 %v1534_v46  ;;  %v1634_v46 = vld [vmem:[#allocation5 + $0xf30] sm:$0xff] }
 0x8e5   :  { %3365 = vmatmul.mubr.f32.gmra.mxu1 %v1298_v58  ;;  %3407 = vmatprep.subr.mxu1 %v1533_v62 }
 0x8e6   :  { %3408 = vmatpush3.msra.mxu1 %v1533_v62  ;;  %v1633_v62 = vld [vmem:[#allocation5 + $0xf20] sm:$0xff] }
 0x8e7   :  { %3409 = vmatprep.subr.mxu1 %v1532_v48 }
 0x8e8   :  { %3410 = vmatpush3.msra.mxu1 %v1532_v48  ;;  %v1758_v48 = vld [vmem:[#allocation5 + $0x1120] sm:$0xff] }
 0x8e9   :  { %3411 = vmatprep.subr.mxu1 %v1531_v63 }
 0x8ea   :  { %3412 = vmatpush3.msra.mxu1 %v1531_v63  ;;  %v1757_v63 = vld [vmem:[#allocation5 + $0x1110] sm:$0xff] }
 0x8eb   :  { %3413 = vmatprep.subr.mxu1 %v1530_v42 }
 0x8ec   :  { %3414 = vmatpush3.msra.mxu1 %v1530_v42  ;;  %v1756_v42 = vld [vmem:[#allocation5 + $0x1100] sm:$0xff] }
 0x8ed   :  { %3415 = vmatprep.subr.mxu1 %v1529_v47 }
 0x8ee   :  { %3416 = vmatpush3.msra.mxu1 %v1529_v47  ;;  %v1755_v47 = vld [vmem:[#allocation5 + $0x10f0] sm:$0xff] }
 0x8ef   :  { %3417 = vmatprep.subr.mxu1 %v1528_v2 }
 0x8f0   :  { %3418 = vmatpush3.msra.mxu1 %v1528_v2  ;;  %v1754_v2 = vld [vmem:[#allocation5 + $0x10e0] sm:$0xff] }
 0x8f1   :  { %3419 = vmatprep.subr.mxu1 %v1527_v3 }
 0x8f2   :  { %3420 = vmatpush3.msra.mxu1 %v1527_v3  ;;  %v1753_v3 = vld [vmem:[#allocation5 + $0x10d0] sm:$0xff] }
 0x8f3   :  { %3421 = vmatprep.subr.mxu1 %v1526_v53 }
 0x8f4   :  { %3422 = vmatpush3.msra.mxu1 %v1526_v53  ;;  %v1752_v53 = vld [vmem:[#allocation5 + $0x10c0] sm:$0xff] }
 0x8f5   :  { %3423 = vmatprep.subr.mxu1 %v1525_v55 }
 0x8f6   :  { %3424 = vmatpush3.msra.mxu1 %v1525_v55  ;;  %v1751_v55 = vld [vmem:[#allocation5 + $0x10b0] sm:$0xff] }
 0x8f7   :  { %3425 = vmatprep.subr.mxu1 %v1524_v4 }
 0x8f8   :  { %3426 = vmatpush3.msra.mxu1 %v1524_v4  ;;  %v1750_v4 = vld [vmem:[#allocation5 + $0x10a0] sm:$0xff] }
 0x8f9   :  { %3427 = vmatprep.subr.mxu1 %v1523_v18 }
 0x8fa   :  { %3428 = vmatpush3.msra.mxu1 %v1523_v18 }
 0x8fb   :  { %3429 = vmatprep.subr.mxu1 %v1522_v19 }
 0x8fc   :  { %3430 = vmatpush3.msra.mxu1 %v1522_v19 }
 0x8fd   :  { %3431 = vmatprep.subr.mxu1 %v1521_v20 }
 0x8fe   :  { %3432 = vmatpush3.msra.mxu1 %v1521_v20 }
 0x8ff   :  { %3433 = vmatprep.subr.mxu1 %v1520_v21 }
 0x900   :  { %3434 = vmatpush3.msra.mxu1 %v1520_v21 }
 0x901   :  { %3435 = vmatprep.subr.mxu1 %v1519_v22 }
 0x902   :  { %3436 = vmatpush3.msra.mxu1 %v1519_v22 }
 0x903   :  { %3481 = vmatprep.subr.mxu1 %v1758_v48 }
 0x99d   :  { %v3363_v6 = vpop.f32.mrf.mxu1 }
 0x99e   :  { %v1388_v7 = vadd.f32 %v3363_v6, %v1315_v5  ;;  %v1748_v6 = vld [vmem:[#allocation5 + $0x1080] sm:$0xff] }
 0x99f   :  { %v1382_v8 = vpop.f32.mrf.mxu1 }
 0x9a0   :  { %v1383_v56 = vadd.f32 %v1382_v8, %v1315_v5  ;;  %v1402_v57 = vmul.f32 0.01, %v1388_v7 }
 0x9a2   :  { %v1401_v9 = vmul.f32 0.01, %v1383_v56  ;;  %v3923_v0 = vmax.f32 %v1388_v7, %v1402_v57  ;;  %v1535_v7 = vld [vmem:[#allocation5 + $0xf10] ss:$0 sm:$0xff] }
 0x9a4   :  { %v3921_v10 = vmax.f32 %v1383_v56, %v1401_v9 }
 0x9a5   :  { %v3366_v11 = vpop.f32.mrf.mxu1 }
 0x9a6   :  { %v1398_v1 = vadd.f32 %v3366_v11, %v1315_v5  ;;  %3399 = vmatprep.mubr.f32.mxu0 %v3921_v10 }
 0x9a7   :  { %v1392_v12 = vpop.f32.mrf.mxu1  ;;  %3400 = vmatmul.mubr.f32.vlgmr.msra.gmra.mxu0 %v3923_v0 }
 0x9a8   :  { %v1393_v13 = vadd.f32 %v1392_v12, %v1315_v5  ;;  %v1404_v14 = vmul.f32 0.01, %v1398_v1  ;;  %3444 = vmatpush3.msra.mxu0 %v1648_v23  ;;  %v1749_v5 = vld [vmem:[#allocation5 + $0x1090] sm:$0xff] }
 0x9a9   :  { %3445 = vmatprep.subr.mxu0 %v1647_v24 }
 0x9aa   :  { %v1403_v15 = vmul.f32 0.01, %v1393_v13  ;;  %v3929_v17 = vmax.f32 %v1398_v1, %v1404_v14  ;;  %3446 = vmatpush3.msra.mxu0 %v1647_v24 }
 0x9ab   :  { %3447 = vmatprep.subr.mxu0 %v1646_v25 }
 0x9ac   :  { %v3927_v16 = vmax.f32 %v1393_v13, %v1403_v15  ;;  %3448 = vmatpush3.msra.mxu0 %v1646_v25 }
 0x9ad   :  { %3449 = vmatprep.subr.mxu0 %v1645_v26 }
 0x9ae   :  { %3402 = vmatprep.mubr.f32.mxu0 %v3927_v16  ;;  %3450 = vmatpush3.msra.mxu0 %v1645_v26 }
 0x9af   :  { %3403 = vmatmul.mubr.f32.gmra.mxu0 %v3929_v17  ;;  %3451 = vmatprep.subr.mxu0 %v1644_v29 }
 0x9b0   :  { %3452 = vmatpush3.msra.mxu0 %v1644_v29 }
 0x9b1   :  { %3453 = vmatprep.subr.mxu0 %v1643_v30 }
 0x9b2   :  { %3454 = vmatpush3.msra.mxu0 %v1643_v30  ;;  %v1745_v30 = vld [vmem:[#allocation5 + $0x1050] sm:$0xff] }
 0x9b3   :  { %3455 = vmatprep.subr.mxu0 %v1642_v31 }
 0x9b4   :  { %3456 = vmatpush3.msra.mxu0 %v1642_v31  ;;  %v1744_v31 = vld [vmem:[#allocation5 + $0x1040] sm:$0xff] }
 0x9b5   :  { %3457 = vmatprep.subr.mxu0 %v1641_v32 }
 0x9b6   :  { %3458 = vmatpush3.msra.mxu0 %v1641_v32  ;;  %v1871_v32 = vld [vmem:[#allocation5 + $0x1220] sm:$0xff] }
 0x9b7   :  { %3459 = vmatprep.subr.mxu0 %v1640_v33 }
 0x9b8   :  { %3460 = vmatpush3.msra.mxu0 %v1640_v33  ;;  %v1870_v33 = vld [vmem:[#allocation5 + $0x1210] sm:$0xff] }
 0x9b9   :  { %3461 = vmatprep.subr.mxu0 %v1639_v34 }
 0x9ba   :  { %3462 = vmatpush3.msra.mxu0 %v1639_v34  ;;  %v1869_v34 = vld [vmem:[#allocation5 + $0x1200] sm:$0xff] }
 0x9bb   :  { %3463 = vmatprep.subr.mxu0 %v1638_v37 }
 0x9bc   :  { %3464 = vmatpush3.msra.mxu0 %v1638_v37 }
 0x9bd   :  { %3465 = vmatprep.subr.mxu0 %v1637_v38 }
 0x9be   :  { %3466 = vmatpush3.msra.mxu0 %v1637_v38 }
 0x9bf   :  { %3467 = vmatprep.subr.mxu0 %v1636_v60 }
 0x9c0   :  { %3468 = vmatpush3.msra.mxu0 %v1636_v60 }
 0x9c1   :  { %3469 = vmatprep.subr.mxu0 %v1635_v61 }
 0x9c2   :  { %3470 = vmatpush3.msra.mxu0 %v1635_v61 }
 0x9c3   :  { %3471 = vmatprep.subr.mxu0 %v1634_v46 }
 0x9c4   :  { %3472 = vmatpush3.msra.mxu0 %v1634_v46 }
 0x9c5   :  { %3473 = vmatprep.subr.mxu0 %v1633_v62 }
 0x9c6   :  { %3474 = vmatpush3.msra.mxu0 %v1633_v62 }
 0xa67   :  { %v3401_v40 = vpop.f32.mrf.mxu0 }
 0xa68   :  { %v1498_v41 = vadd.f32 %v3401_v40, %v1425_v39  ;;  %v1867_v40 = vld [vmem:[#allocation5 + $0x11e0] sm:$0xff] }
 0xa69   :  { %v1492_v43 = vpop.f32.mrf.mxu0 }
 0xa6a   :  { %v1493_v44 = vadd.f32 %v1492_v43, %v1425_v39  ;;  %v1512_v45 = vmul.f32 0.01, %v1498_v41  ;;  %v1865_v43 = vld [vmem:[#allocation5 + $0x11c0] sm:$0xff] }
 0xa6c   :  { %v1511_v27 = vmul.f32 0.01, %v1493_v44  ;;  %v1516_v49 = vmax.f32 %v1498_v41, %v1512_v45  ;;  %v1866_v41 = vld [vmem:[#allocation5 + $0x11d0] sm:$0xff]  ;;  %v1863_v45 = vld [vmem:[#allocation5 + $0x11a0] sm:$0xff] }
 0xa6e   :  { %v1515_v28 = vmax.f32 %v1493_v44, %v1511_v27  ;;  %v1864_v44 = vld [vmem:[#allocation5 + $0x11b0] sm:$0xff]  ;;  %v1649_v27 = vld [vmem:[#allocation5 + $0x1020] ss:$0 sm:$0xff] }
 0xa6f   :  { %v3404_v50 = vpop.f32.mrf.mxu0 }
 0xa70   :  { %v1508_v35 = vadd.f32 %v3404_v50, %v1425_v39  ;;  %3437 = vmatprep.mubr.f32.mxu1 %v1515_v28 }
 0xa71   :  { %v1502_v36 = vpop.f32.mrf.mxu0  ;;  %3438 = vmatmul.mubr.f32.vlgmr.msra.gmra.mxu1 %v1516_v49 }
 0xa72   :  { %v1503_v51 = vadd.f32 %v1502_v36, %v1425_v39  ;;  %v1514_v52 = vmul.f32 0.01, %v1508_v35  ;;  %3482 = vmatpush3.msra.mxu1 %v1758_v48  ;;  %v1868_v39 = vld [vmem:[#allocation5 + $0x11f0] sm:$0xff] }
 0xa73   :  { %3483 = vmatprep.subr.mxu1 %v1757_v63  ;;  %v1862_v48 = vld [vmem:[#allocation5 + $0x1190] sm:$0xff] }
 0xa74   :  { %v1513_v54 = vmul.f32 0.01, %v1503_v51  ;;  %v1518_v59 = vmax.f32 %v1508_v35, %v1514_v52  ;;  %3484 = vmatpush3.msra.mxu1 %v1757_v63  ;;  %v1861_v63 = vld [vmem:[#allocation5 + $0x1180] sm:$0xff] }
 0xa75   :  { %3485 = vmatprep.subr.mxu1 %v1756_v42 }
 0xa76   :  { %v1517_v58 = vmax.f32 %v1503_v51, %v1513_v54  ;;  %3486 = vmatpush3.msra.mxu1 %v1756_v42  ;;  %v1860_v42 = vld [vmem:[#allocation5 + $0x1170] sm:$0xff] }
 0xa77   :  { %3487 = vmatprep.subr.mxu1 %v1755_v47 }
 0xa78   :  { %3440 = vmatprep.mubr.f32.mxu1 %v1517_v58  ;;  %3488 = vmatpush3.msra.mxu1 %v1755_v47  ;;  %v1859_v47 = vld [vmem:[#allocation5 + $0x1160] sm:$0xff] }
 0xa79   :  { %3441 = vmatmul.mubr.f32.gmra.mxu1 %v1518_v59  ;;  %3489 = vmatprep.subr.mxu1 %v1754_v2 }
 0xa7a   :  { %3490 = vmatpush3.msra.mxu1 %v1754_v2  ;;  %v1858_v2 = vld [vmem:[#allocation5 + $0x1150] sm:$0xff] }
 0xa7b   :  { %3491 = vmatprep.subr.mxu1 %v1753_v3 }
 0xa7c   :  { %3492 = vmatpush3.msra.mxu1 %v1753_v3  ;;  %v1857_v3 = vld [vmem:[#allocation5 + $0x1140] sm:$0xff] }
 0xa7d   :  { %3493 = vmatprep.subr.mxu1 %v1752_v53 }
 0xa7e   :  { %3494 = vmatpush3.msra.mxu1 %v1752_v53  ;;  %v1982_v53 = vld [vmem:[#allocation5 + $0x1340] sm:$0xff] }
 0xa7f   :  { %3495 = vmatprep.subr.mxu1 %v1751_v55 }
 0xa80   :  { %3496 = vmatpush3.msra.mxu1 %v1751_v55  ;;  %v1981_v55 = vld [vmem:[#allocation5 + $0x1330] sm:$0xff] }
 0xa81   :  { %3497 = vmatprep.subr.mxu1 %v1750_v4 }
 0xa82   :  { %3498 = vmatpush3.msra.mxu1 %v1750_v4  ;;  %v1980_v4 = vld [vmem:[#allocation5 + $0x1320] sm:$0xff] }
 0xa83   :  { %3499 = vmatprep.subr.mxu1 %v1749_v5 }
 0xa84   :  { %3500 = vmatpush3.msra.mxu1 %v1749_v5  ;;  %v1979_v5 = vld [vmem:[#allocation5 + $0x1310] sm:$0xff] }
 0xa85   :  { %3501 = vmatprep.subr.mxu1 %v1748_v6 }
 0xa86   :  { %3502 = vmatpush3.msra.mxu1 %v1748_v6  ;;  %v1978_v6 = vld [vmem:[#allocation5 + $0x1300] sm:$0xff] }
 0xb31   :  { %v3439_v8 = vpop.f32.mrf.mxu1 }
 0xb32   :  { %v1608_v56 = vadd.f32 %v3439_v8, %v1535_v7  ;;  %v1976_v8 = vld [vmem:[#allocation5 + $0x12e0] sm:$0xff] }
 0xb33   :  { %v1602_v57 = vpop.f32.mrf.mxu1 }
 0xb34   :  { %v1622_v9 = vmul.f32 0.01, %v1608_v56  ;;  %v1603_v11 = vadd.f32 %v1602_v57, %v1535_v7  ;;  %v1974_v57 = vld [vmem:[#allocation5 + $0x12c0] sm:$0xff] }
 0xb36   :  { %v1621_v1 = vmul.f32 0.01, %v1603_v11  ;;  %v1626_v12 = vmax.f32 %v1608_v56, %v1622_v9  ;;  %v1975_v56 = vld [vmem:[#allocation5 + $0x12d0] sm:$0xff] }
 0xb37   :  { %v1973_v9 = vld [vmem:[#allocation5 + $0x12b0] sm:$0xff] }
 0xb38   :  { %v1625_v13 = vmax.f32 %v1603_v11, %v1621_v1  ;;  %v3937_v19 = vadd.f32 %v1626_v12, %v3923_v0  ;;  %v1746_v0 = vld [vmem:[#allocation5 + $0x1060] sm:$0xff]  ;;  %v1759_v1 = vld [vmem:[#allocation5 + $0x1130] ss:$0 sm:$0xff] }
 0xb39   :  { %v3442_v14 = vpop.f32.mrf.mxu1  ;;  %v1972_v11 = vld [vmem:[#allocation5 + $0x12a0] sm:$0xff] }
 0xb3a   :  { %v1618_v15 = vadd.f32 %v3442_v14, %v1535_v7  ;;  %v3934_v18 = vadd.f32 %v1625_v13, %v3921_v10  ;;  %v1747_v10 = vld [vmem:[#allocation5 + $0x1070] sm:$0xff] }
 0xb3b   :  { %v1612_v20 = vpop.f32.mrf.mxu1  ;;  %3503 = vmatprep.subr.mxu1 %v1747_v10 }
 0xb3c   :  { %v1624_v21 = vmul.f32 0.01, %v1618_v15  ;;  %v1613_v22 = vadd.f32 %v1612_v20, %v1535_v7  ;;  %3475 = vmatprep.mubr.f32.mxu0 %v3934_v18  ;;  %3504 = vmatpush3.msra.mxu1 %v1747_v10  ;;  %v1977_v7 = vld [vmem:[#allocation5 + $0x12f0] sm:$0xff] }
 0xb3d   :  { %3476 = vmatmul.mubr.f32.vlgmr.msra.gmra.mxu0 %v3937_v19  ;;  %3505 = vmatprep.subr.mxu1 %v1746_v0 }
 0xb3e   :  { %v1623_v23 = vmul.f32 0.01, %v1613_v22  ;;  %v1628_v24 = vmax.f32 %v1618_v15, %v1624_v21  ;;  %3506 = vmatpush3.msra.mxu1 %v1746_v0 }
 0xb3f   :  { %3507 = vmatprep.subr.mxu1 %v1745_v30 }
 0xb40   :  { %v1627_v25 = vmax.f32 %v1613_v22, %v1623_v23  ;;  %v3945_v29 = vadd.f32 %v1628_v24, %v3929_v17  ;;  %3508 = vmatpush3.msra.mxu1 %v1745_v30  ;;  %v1872_v17 = vld [vmem:[#allocation5 + $0x1230] sm:$0xff] }
 0xb41   :  { %3509 = vmatprep.subr.mxu1 %v1744_v31  ;;  %3519 = vmatprep.subr.mxu0 %v1872_v17 }
 0xb42   :  { %v3942_v26 = vadd.f32 %v1627_v25, %v3927_v16  ;;  %3510 = vmatpush3.msra.mxu1 %v1744_v31  ;;  %v1743_v16 = vld [vmem:[#allocation5 + $0x1030] sm:$0xff]  ;;  %3520 = vmatpush3.msra.mxu0 %v1872_v17 }
 0xb43   :  { %3511 = vmatprep.subr.mxu1 %v1743_v16  ;;  %3521 = vmatprep.subr.mxu0 %v1871_v32 }
 0xb44   :  { %3478 = vmatprep.mubr.f32.mxu0 %v3942_v26  ;;  %3512 = vmatpush3.msra.mxu1 %v1743_v16 }
 0xb45   :  { %3479 = vmatmul.mubr.f32.gmra.mxu0 %v3945_v29  ;;  %3557 = vmatprep.subr.mxu1 %v1982_v53 }
 0xb46   :  { %3522 = vmatpush3.msra.mxu0 %v1871_v32 }
 0xb47   :  { %3523 = vmatprep.subr.mxu0 %v1870_v33 }
 0xb48   :  { %3524 = vmatpush3.msra.mxu0 %v1870_v33 }
 0xb49   :  { %3525 = vmatprep.subr.mxu0 %v1869_v34 }
 0xb4a   :  { %3526 = vmatpush3.msra.mxu0 %v1869_v34 }
 0xb4b   :  { %3527 = vmatprep.subr.mxu0 %v1868_v39 }
 0xb4c   :  { %3528 = vmatpush3.msra.mxu0 %v1868_v39 }
 0xb4d   :  { %3529 = vmatprep.subr.mxu0 %v1867_v40 }
 0xb4e   :  { %3530 = vmatpush3.msra.mxu0 %v1867_v40  ;;  %v1971_v40 = vld [vmem:[#allocation5 + $0x1290] sm:$0xff] }
 0xb4f   :  { %3531 = vmatprep.subr.mxu0 %v1866_v41 }
 0xb50   :  { %3532 = vmatpush3.msra.mxu0 %v1866_v41  ;;  %v1968_v41 = vld [vmem:[#allocation5 + $0x1260] sm:$0xff] }
 0xb51   :  { %3533 = vmatprep.subr.mxu0 %v1865_v43 }
 0xb52   :  { %3534 = vmatpush3.msra.mxu0 %v1865_v43  ;;  %v1967_v43 = vld [vmem:[#allocation5 + $0x1250] sm:$0xff] }
 0xb53   :  { %3535 = vmatprep.subr.mxu0 %v1864_v44 }
 0xb54   :  { %3536 = vmatpush3.msra.mxu0 %v1864_v44  ;;  %v2091_v44 = vld [vmem:[#allocation5 + $0x1440] sm:$0xff] }
 0xb55   :  { %3537 = vmatprep.subr.mxu0 %v1863_v45 }
 0xb56   :  { %3538 = vmatpush3.msra.mxu0 %v1863_v45  ;;  %v2089_v45 = vld [vmem:[#allocation5 + $0x1420] sm:$0xff] }
 0xb57   :  { %3539 = vmatprep.subr.mxu0 %v1862_v48 }
 0xb58   :  { %3540 = vmatpush3.msra.mxu0 %v1862_v48 }
 0xb59   :  { %3541 = vmatprep.subr.mxu0 %v1861_v63 }
 0xb5a   :  { %3542 = vmatpush3.msra.mxu0 %v1861_v63 }
 0xb5b   :  { %3543 = vmatprep.subr.mxu0 %v1860_v42 }
 0xb5c   :  { %3544 = vmatpush3.msra.mxu0 %v1860_v42 }
 0xb5d   :  { %3545 = vmatprep.subr.mxu0 %v1859_v47 }
 0xb5e   :  { %3546 = vmatpush3.msra.mxu0 %v1859_v47 }
 0xb5f   :  { %3547 = vmatprep.subr.mxu0 %v1858_v2 }
 0xb60   :  { %3548 = vmatpush3.msra.mxu0 %v1858_v2 }
 0xb61   :  { %3549 = vmatprep.subr.mxu0 %v1857_v3 }
 0xb62   :  { %3550 = vmatpush3.msra.mxu0 %v1857_v3 }
 0xbfd   :  { %v3477_v28 = vpop.f32.mrf.mxu0 }
 0xbfe   :  { %v1722_v49 = vadd.f32 %v3477_v28, %v1649_v27  ;;  %v2087_v28 = vld [vmem:[#allocation5 + $0x1400] sm:$0xff] }
 0xbff   :  { %v1716_v50 = vpop.f32.mrf.mxu0 }
 0xc00   :  { %v1717_v35 = vadd.f32 %v1716_v50, %v1649_v27  ;;  %v1736_v36 = vmul.f32 0.01, %v1722_v49  ;;  %v2085_v50 = vld [vmem:[#allocation5 + $0x13e0] sm:$0xff] }
 0xc02   :  { %v1735_v51 = vmul.f32 0.01, %v1717_v35  ;;  %v1740_v54 = vmax.f32 %v1722_v49, %v1736_v36  ;;  %v2086_v49 = vld [vmem:[#allocation5 + $0x13f0] sm:$0xff]  ;;  %v2083_v36 = vld [vmem:[#allocation5 + $0x13c0] sm:$0xff] }
 0xc04   :  { %v1739_v52 = vmax.f32 %v1717_v35, %v1735_v51  ;;  %v2084_v35 = vld [vmem:[#allocation5 + $0x13d0] sm:$0xff] }
 0xc05   :  { %v3480_v58 = vpop.f32.mrf.mxu0  ;;  %v2082_v51 = vld [vmem:[#allocation5 + $0x13b0] sm:$0xff] }
 0xc06   :  { %v1732_v59 = vadd.f32 %v3480_v58, %v1649_v27  ;;  %3513 = vmatprep.mubr.f32.mxu1 %v1739_v52  ;;  %v1873_v52 = vld [vmem:[#allocation5 + $0x1240] ss:$0 sm:$0xff] }
 0xc07   :  { %v1726_v37 = vpop.f32.mrf.mxu0  ;;  %3514 = vmatmul.mubr.f32.vlgmr.msra.gmra.mxu1 %v1740_v54 }
 0xc08   :  { %v1727_v38 = vadd.f32 %v1726_v37, %v1649_v27  ;;  %v1738_v60 = vmul.f32 0.01, %v1732_v59  ;;  %3558 = vmatpush3.msra.mxu1 %v1982_v53  ;;  %v2088_v27 = vld [vmem:[#allocation5 + $0x1410] sm:$0xff] }
 0xc09   :  { %3559 = vmatprep.subr.mxu1 %v1981_v55 }
 0xc0a   :  { %v1737_v61 = vmul.f32 0.01, %v1727_v38  ;;  %v1742_v62 = vmax.f32 %v1732_v59, %v1738_v60  ;;  %3560 = vmatpush3.msra.mxu1 %v1981_v55  ;;  %v2081_v55 = vld [vmem:[#allocation5 + $0x13a0] sm:$0xff] }
 0xc0b   :  { %3561 = vmatprep.subr.mxu1 %v1980_v4 }
 0xc0c   :  { %v1741_v46 = vmax.f32 %v1727_v38, %v1737_v61  ;;  %3562 = vmatpush3.msra.mxu1 %v1980_v4  ;;  %v2080_v4 = vld [vmem:[#allocation5 + $0x1390] sm:$0xff] }
 0xc0d   :  { %3563 = vmatprep.subr.mxu1 %v1979_v5 }
 0xc0e   :  { %3516 = vmatprep.mubr.f32.mxu1 %v1741_v46  ;;  %3564 = vmatpush3.msra.mxu1 %v1979_v5  ;;  %v2079_v5 = vld [vmem:[#allocation5 + $0x1380] sm:$0xff] }
 0xc0f   :  { %3517 = vmatmul.mubr.f32.gmra.mxu1 %v1742_v62  ;;  %3565 = vmatprep.subr.mxu1 %v1978_v6 }
 0xc10   :  { %3566 = vmatpush3.msra.mxu1 %v1978_v6  ;;  %v2078_v6 = vld [vmem:[#allocation5 + $0x1370] sm:$0xff] }
 0xc11   :  { %3567 = vmatprep.subr.mxu1 %v1977_v7 }
 0xc12   :  { %3568 = vmatpush3.msra.mxu1 %v1977_v7  ;;  %v2077_v7 = vld [vmem:[#allocation5 + $0x1360] sm:$0xff] }
 0xc13   :  { %3569 = vmatprep.subr.mxu1 %v1976_v8 }
 0xc14   :  { %3570 = vmatpush3.msra.mxu1 %v1976_v8  ;;  %v2206_v8 = vld [vmem:[#allocation5 + $0x1560] sm:$0xff] }
 0xc15   :  { %3571 = vmatprep.subr.mxu1 %v1975_v56 }
 0xc16   :  { %3572 = vmatpush3.msra.mxu1 %v1975_v56  ;;  %v2205_v56 = vld [vmem:[#allocation5 + $0x1550] sm:$0xff] }
 0xc17   :  { %3573 = vmatprep.subr.mxu1 %v1974_v57 }
 0xc18   :  { %3574 = vmatpush3.msra.mxu1 %v1974_v57  ;;  %v2204_v57 = vld [vmem:[#allocation5 + $0x1540] sm:$0xff] }
 0xc19   :  { %3575 = vmatprep.subr.mxu1 %v1973_v9 }
 0xc1a   :  { %3576 = vmatpush3.msra.mxu1 %v1973_v9  ;;  %v2203_v9 = vld [vmem:[#allocation5 + $0x1530] sm:$0xff] }
 0xc1b   :  { %3577 = vmatprep.subr.mxu1 %v1972_v11 }
 0xc1c   :  { %3578 = vmatpush3.msra.mxu1 %v1972_v11  ;;  %v2202_v11 = vld [vmem:[#allocation5 + $0x1520] sm:$0xff] }
 0xc1d   :  { %3579 = vmatprep.subr.mxu1 %v1971_v40 }
 0xc1e   :  { %3580 = vmatpush3.msra.mxu1 %v1971_v40 }
 0xcc7   :  { %v3515_v12 = vpop.f32.mrf.mxu1 }
 0xcc8   :  { %v1832_v13 = vadd.f32 %v3515_v12, %v1759_v1  ;;  %v2200_v12 = vld [vmem:[#allocation5 + $0x1500] sm:$0xff] }
 0xcc9   :  { %v1826_v14 = vpop.f32.mrf.mxu1 }
 0xcca   :  { %v1846_v15 = vmul.f32 0.01, %v1832_v13  ;;  %v1827_v20 = vadd.f32 %v1826_v14, %v1759_v1  ;;  %v2198_v14 = vld [vmem:[#allocation5 + $0x14e0] sm:$0xff] }
 0xccc   :  { %v1845_v21 = vmul.f32 0.01, %v1827_v20  ;;  %v1850_v22 = vmax.f32 %v1832_v13, %v1846_v15  ;;  %v2199_v13 = vld [vmem:[#allocation5 + $0x14f0] sm:$0xff] }
 0xccd   :  { %v2197_v15 = vld [vmem:[#allocation5 + $0x14d0] sm:$0xff] }
 0xcce   :  { %v1849_v23 = vmax.f32 %v1827_v20, %v1845_v21  ;;  %v1854_v0 = vadd.f32 %v1850_v22, %v3937_v19  ;;  %v1969_v19 = vld [vmem:[#allocation5 + $0x1270] sm:$0xff] }
 0xccf   :  { %v3518_v24 = vpop.f32.mrf.mxu1  ;;  %v1983_v20 = vld [vmem:[#allocation5 + $0x1350] ss:$0 sm:$0xff] }
 0xcd0   :  { %v1842_v25 = vadd.f32 %v3518_v24, %v1759_v1  ;;  %v1853_v10 = vadd.f32 %v1849_v23, %v3934_v18  ;;  %v1970_v18 = vld [vmem:[#allocation5 + $0x1280] sm:$0xff] }
 0xcd1   :  { %v1836_v30 = vpop.f32.mrf.mxu1  ;;  %3581 = vmatprep.subr.mxu1 %v1970_v18 }
 0xcd2   :  { %v1848_v31 = vmul.f32 0.01, %v1842_v25  ;;  %v1837_v16 = vadd.f32 %v1836_v30, %v1759_v1  ;;  %3551 = vmatprep.mubr.f32.mxu0 %v1853_v10  ;;  %3582 = vmatpush3.msra.mxu1 %v1970_v18  ;;  %v2201_v1 = vld [vmem:[#allocation5 + $0x1510] sm:$0xff]  ;;  %v2196_v18 = vld [vmem:[#allocation5 + $0x14c0] sm:$0xff] }
 0xcd3   :  { %3552 = vmatmul.mubr.f32.vlgmr.msra.gmra.mxu0 %v1854_v0  ;;  %3583 = vmatprep.subr.mxu1 %v1969_v19 }
 0xcd4   :  { %v1847_v17 = vmul.f32 0.01, %v1837_v16  ;;  %v1852_v32 = vmax.f32 %v1842_v25, %v1848_v31  ;;  %3584 = vmatpush3.msra.mxu1 %v1969_v19  ;;  %v2195_v19 = vld [vmem:[#allocation5 + $0x14b0] sm:$0xff] }
 0xcd5   :  { %3585 = vmatprep.subr.mxu1 %v1968_v41 }
 0xcd6   :  { %v1851_v33 = vmax.f32 %v1837_v16, %v1847_v17  ;;  %v1856_v39 = vadd.f32 %v1852_v32, %v3945_v29  ;;  %3586 = vmatpush3.msra.mxu1 %v1968_v41  ;;  %v2090_v29 = vld [vmem:[#allocation5 + $0x1430] sm:$0xff]  ;;  %v2194_v41 = vld [vmem:[#allocation5 + $0x14a0] sm:$0xff] }
 0xcd7   :  { %3587 = vmatprep.subr.mxu1 %v1967_v43 }
 0xcd8   :  { %v1855_v34 = vadd.f32 %v1851_v33, %v3942_v26  ;;  %3588 = vmatpush3.msra.mxu1 %v1967_v43  ;;  %v2092_v26 = vld [vmem:[#allocation5 + $0x1450] sm:$0xff] }
 0xcd9   :  { %3595 = vmatprep.subr.mxu0 %v2092_v26  ;;  %3633 = vmatprep.subr.mxu1 %v2206_v8  ;;  %v2193_v43 = vld [vmem:[#allocation5 + $0x1490] sm:$0xff] }
 0xcda   :  { %3554 = vmatprep.mubr.f32.mxu0 %v1855_v34  ;;  %3596 = vmatpush3.msra.mxu0 %v2092_v26  ;;  %v2192_v26 = vld [vmem:[#allocation5 + $0x1480] sm:$0xff] }
 0xcdb   :  { %3555 = vmatmul.mubr.f32.gmra.mxu0 %v1856_v39  ;;  %3597 = vmatprep.subr.mxu0 %v2091_v44 }
 0xcdc   :  { %3598 = vmatpush3.msra.mxu0 %v2091_v44  ;;  %v2191_v44 = vld [vmem:[#allocation5 + $0x1470] sm:$0xff] }
 0xcdd   :  { %3599 = vmatprep.subr.mxu0 %v2090_v29 }
 0xcde   :  { %3600 = vmatpush3.msra.mxu0 %v2090_v29  ;;  %v2316_v29 = vld [vmem:[#allocation5 + $0x1670] sm:$0xff] }
 0xcdf   :  { %3601 = vmatprep.subr.mxu0 %v2089_v45 }
 0xce0   :  { %3602 = vmatpush3.msra.mxu0 %v2089_v45  ;;  %v2315_v45 = vld [vmem:[#allocation5 + $0x1660] sm:$0xff] }
 0xce1   :  { %3603 = vmatprep.subr.mxu0 %v2088_v27 }
 0xce2   :  { %3604 = vmatpush3.msra.mxu0 %v2088_v27  ;;  %v2314_v27 = vld [vmem:[#allocation5 + $0x1650] sm:$0xff] }
 0xce3   :  { %3605 = vmatprep.subr.mxu0 %v2087_v28 }
 0xce4   :  { %3606 = vmatpush3.msra.mxu0 %v2087_v28  ;;  %v2313_v28 = vld [vmem:[#allocation5 + $0x1640] sm:$0xff] }
 0xce5   :  { %3607 = vmatprep.subr.mxu0 %v2086_v49 }
 0xce6   :  { %3608 = vmatpush3.msra.mxu0 %v2086_v49  ;;  %v2312_v49 = vld [vmem:[#allocation5 + $0x1630] sm:$0xff] }
 0xce7   :  { %3609 = vmatprep.subr.mxu0 %v2085_v50 }
 0xce8   :  { %3610 = vmatpush3.msra.mxu0 %v2085_v50  ;;  %v2311_v50 = vld [vmem:[#allocation5 + $0x1620] sm:$0xff] }
 0xce9   :  { %3611 = vmatprep.subr.mxu0 %v2084_v35 }
 0xcea   :  { %3612 = vmatpush3.msra.mxu0 %v2084_v35  ;;  %v2310_v35 = vld [vmem:[#allocation5 + $0x1610] sm:$0xff] }
 0xceb   :  { %3613 = vmatprep.subr.mxu0 %v2083_v36 }
 0xcec   :  { %3614 = vmatpush3.msra.mxu0 %v2083_v36  ;;  %v2309_v36 = vld [vmem:[#allocation5 + $0x1600] sm:$0xff] }
 0xced   :  { %3615 = vmatprep.subr.mxu0 %v2082_v51 }
 0xcee   :  { %3616 = vmatpush3.msra.mxu0 %v2082_v51  ;;  %v2308_v51 = vld [vmem:[#allocation5 + $0x15f0] sm:$0xff] }
 0xcef   :  { %3617 = vmatprep.subr.mxu0 %v2081_v55 }
 0xcf0   :  { %3618 = vmatpush3.msra.mxu0 %v2081_v55 }
 0xcf1   :  { %3619 = vmatprep.subr.mxu0 %v2080_v4 }
 0xcf2   :  { %3620 = vmatpush3.msra.mxu0 %v2080_v4 }
 0xcf3   :  { %3621 = vmatprep.subr.mxu0 %v2079_v5 }
 0xcf4   :  { %3622 = vmatpush3.msra.mxu0 %v2079_v5 }
 0xcf5   :  { %3623 = vmatprep.subr.mxu0 %v2078_v6 }
 0xcf6   :  { %3624 = vmatpush3.msra.mxu0 %v2078_v6 }
 0xcf7   :  { %3625 = vmatprep.subr.mxu0 %v2077_v7 }
 0xcf8   :  { %3626 = vmatpush3.msra.mxu0 %v2077_v7 }
 0xcf9   :  { %3671 = vmatprep.subr.mxu0 %v2316_v29 }
 0xd93   :  { %v3553_v54 = vpop.f32.mrf.mxu0 }
 0xd94   :  { %v1946_v58 = vadd.f32 %v3553_v54, %v1873_v52  ;;  %v2306_v54 = vld [vmem:[#allocation5 + $0x15d0] sm:$0xff] }
 0xd95   :  { %v1940_v59 = vpop.f32.mrf.mxu0 }
 0xd96   :  { %v1941_v37 = vadd.f32 %v1940_v59, %v1873_v52  ;;  %v1960_v38 = vmul.f32 0.01, %v1946_v58 }
 0xd98   :  { %v1959_v60 = vmul.f32 0.01, %v1941_v37  ;;  %v3955_v46 = vmax.f32 %v1946_v58, %v1960_v38  ;;  %v2093_v58 = vld [vmem:[#allocation5 + $0x1460] ss:$0 sm:$0xff] }
 0xd9a   :  { %v3953_v61 = vmax.f32 %v1941_v37, %v1959_v60 }
 0xd9b   :  { %v3556_v62 = vpop.f32.mrf.mxu0 }
 0xd9c   :  { %v1956_v48 = vadd.f32 %v3556_v62, %v1873_v52  ;;  %3589 = vmatprep.mubr.f32.mxu1 %v3953_v61 }
 0xd9d   :  { %v1950_v63 = vpop.f32.mrf.mxu0  ;;  %3590 = vmatmul.mubr.f32.vlgmr.msra.gmra.mxu1 %v3955_v46 }
 0xd9e   :  { %v1951_v42 = vadd.f32 %v1950_v63, %v1873_v52  ;;  %v1962_v47 = vmul.f32 0.01, %v1956_v48  ;;  %3634 = vmatpush3.msra.mxu1 %v2206_v8  ;;  %v2307_v52 = vld [vmem:[#allocation5 + $0x15e0] sm:$0xff] }
 0xd9f   :  { %3635 = vmatprep.subr.mxu1 %v2205_v56 }
 0xda0   :  { %v1961_v2 = vmul.f32 0.01, %v1951_v42  ;;  %v3961_v53 = vmax.f32 %v1956_v48, %v1962_v47  ;;  %3636 = vmatpush3.msra.mxu1 %v2205_v56 }
 0xda1   :  { %3637 = vmatprep.subr.mxu1 %v2204_v57 }
 0xda2   :  { %v3959_v3 = vmax.f32 %v1951_v42, %v1961_v2  ;;  %3638 = vmatpush3.msra.mxu1 %v2204_v57 }
 0xda3   :  { %3639 = vmatprep.subr.mxu1 %v2203_v9 }
 0xda4   :  { %3592 = vmatprep.mubr.f32.mxu1 %v3959_v3  ;;  %3640 = vmatpush3.msra.mxu1 %v2203_v9 }
 0xda5   :  { %3593 = vmatmul.mubr.f32.gmra.mxu1 %v3961_v53  ;;  %3641 = vmatprep.subr.mxu1 %v2202_v11 }
 0xda6   :  { %3642 = vmatpush3.msra.mxu1 %v2202_v11 }
 0xda7   :  { %3643 = vmatprep.subr.mxu1 %v2201_v1 }
 0xda8   :  { %3644 = vmatpush3.msra.mxu1 %v2201_v1  ;;  %v2303_v1 = vld [vmem:[#allocation5 + $0x15a0] sm:$0xff] }
 0xda9   :  { %3645 = vmatprep.subr.mxu1 %v2200_v12 }
 0xdaa   :  { %3646 = vmatpush3.msra.mxu1 %v2200_v12  ;;  %v2302_v12 = vld [vmem:[#allocation5 + $0x1590] sm:$0xff] }
 0xdab   :  { %3647 = vmatprep.subr.mxu1 %v2199_v13 }
 0xdac   :  { %3648 = vmatpush3.msra.mxu1 %v2199_v13  ;;  %v2429_v13 = vld [vmem:[#allocation5 + $0x1770] sm:$0xff] }
 0xdad   :  { %3649 = vmatprep.subr.mxu1 %v2198_v14 }
 0xdae   :  { %3650 = vmatpush3.msra.mxu1 %v2198_v14  ;;  %v2428_v14 = vld [vmem:[#allocation5 + $0x1760] sm:$0xff] }
 0xdaf   :  { %3651 = vmatprep.subr.mxu1 %v2197_v15 }
 0xdb0   :  { %3652 = vmatpush3.msra.mxu1 %v2197_v15  ;;  %v2427_v15 = vld [vmem:[#allocation5 + $0x1750] sm:$0xff] }
 0xdb1   :  { %3653 = vmatprep.subr.mxu1 %v2196_v18 }
 0xdb2   :  { %3654 = vmatpush3.msra.mxu1 %v2196_v18 }
 0xdb3   :  { %3655 = vmatprep.subr.mxu1 %v2195_v19 }
 0xdb4   :  { %3656 = vmatpush3.msra.mxu1 %v2195_v19 }
 0xdb5   :  { %3657 = vmatprep.subr.mxu1 %v2194_v41 }
 0xdb6   :  { %3658 = vmatpush3.msra.mxu1 %v2194_v41 }
 0xdb7   :  { %3659 = vmatprep.subr.mxu1 %v2193_v43 }
 0xdb8   :  { %3660 = vmatpush3.msra.mxu1 %v2193_v43 }
 0xdb9   :  { %3661 = vmatprep.subr.mxu1 %v2192_v26 }
 0xdba   :  { %3662 = vmatpush3.msra.mxu1 %v2192_v26 }
 0xdbb   :  { %3663 = vmatprep.subr.mxu1 %v2191_v44 }
 0xdbc   :  { %3664 = vmatpush3.msra.mxu1 %v2191_v44 }
 0xe5d   :  { %v3591_v21 = vpop.f32.mrf.mxu1 }
 0xe5e   :  { %v2056_v22 = vadd.f32 %v3591_v21, %v1983_v20  ;;  %v2425_v21 = vld [vmem:[#allocation5 + $0x1730] sm:$0xff] }
 0xe5f   :  { %v2050_v23 = vpop.f32.mrf.mxu1 }
 0xe60   :  { %v2051_v24 = vadd.f32 %v2050_v23, %v1983_v20  ;;  %v2070_v25 = vmul.f32 0.01, %v2056_v22  ;;  %v2423_v23 = vld [vmem:[#allocation5 + $0x1710] sm:$0xff] }
 0xe62   :  { %v2069_v10 = vmul.f32 0.01, %v2051_v24  ;;  %v2074_v30 = vmax.f32 %v2056_v22, %v2070_v25  ;;  %v2424_v22 = vld [vmem:[#allocation5 + $0x1720] sm:$0xff]  ;;  %v2421_v25 = vld [vmem:[#allocation5 + $0x16f0] sm:$0xff] }
 0xe64   :  { %v2073_v0 = vmax.f32 %v2051_v24, %v2069_v10  ;;  %v2422_v24 = vld [vmem:[#allocation5 + $0x1700] sm:$0xff]  ;;  %v2207_v10 = vld [vmem:[#allocation5 + $0x1570] ss:$0 sm:$0xff] }
 0xe65   :  { %v3594_v31 = vpop.f32.mrf.mxu1 }
 0xe66   :  { %v2066_v16 = vadd.f32 %v3594_v31, %v1983_v20  ;;  %3627 = vmatprep.mubr.f32.mxu0 %v2073_v0 }
 0xe67   :  { %v2060_v17 = vpop.f32.mrf.mxu1  ;;  %3628 = vmatmul.mubr.f32.vlgmr.msra.gmra.mxu0 %v2074_v30 }
 0xe68   :  { %v2061_v32 = vadd.f32 %v2060_v17, %v1983_v20  ;;  %v2072_v33 = vmul.f32 0.01, %v2066_v16  ;;  %3672 = vmatpush3.msra.mxu0 %v2316_v29  ;;  %v2426_v20 = vld [vmem:[#allocation5 + $0x1740] sm:$0xff] }
 0xe69   :  { %3673 = vmatprep.subr.mxu0 %v2315_v45  ;;  %v2420_v29 = vld [vmem:[#allocation5 + $0x16e0] sm:$0xff] }
 0xe6a   :  { %v2071_v34 = vmul.f32 0.01, %v2061_v32  ;;  %v2076_v40 = vmax.f32 %v2066_v16, %v2072_v33  ;;  %3674 = vmatpush3.msra.mxu0 %v2315_v45  ;;  %v2419_v45 = vld [vmem:[#allocation5 + $0x16d0] sm:$0xff] }
 0xe6b   :  { %3675 = vmatprep.subr.mxu0 %v2314_v27 }
 0xe6c   :  { %v2075_v39 = vmax.f32 %v2061_v32, %v2071_v34  ;;  %3676 = vmatpush3.msra.mxu0 %v2314_v27  ;;  %v2418_v27 = vld [vmem:[#allocation5 + $0x16c0] sm:$0xff] }
 0xe6d   :  { %3677 = vmatprep.subr.mxu0 %v2313_v28 }
 0xe6e   :  { %3630 = vmatprep.mubr.f32.mxu0 %v2075_v39  ;;  %3678 = vmatpush3.msra.mxu0 %v2313_v28  ;;  %v2417_v28 = vld [vmem:[#allocation5 + $0x16b0] sm:$0xff] }
 0xe6f   :  { %3631 = vmatmul.mubr.f32.gmra.mxu0 %v2076_v40  ;;  %3679 = vmatprep.subr.mxu0 %v2312_v49 }
 0xe70   :  { %3680 = vmatpush3.msra.mxu0 %v2312_v49  ;;  %v2416_v49 = vld [vmem:[#allocation5 + $0x16a0] sm:$0xff] }
 0xe71   :  { %3681 = vmatprep.subr.mxu0 %v2311_v50 }
 0xe72   :  { %3682 = vmatpush3.msra.mxu0 %v2311_v50  ;;  %v2415_v50 = vld [vmem:[#allocation5 + $0x1690] sm:$0xff] }
 0xe73   :  { %3683 = vmatprep.subr.mxu0 %v2310_v35 }
 0xe74   :  { %3684 = vmatpush3.msra.mxu0 %v2310_v35  ;;  %v2317_v35 = vld [vmem:[#allocation5 + $0x1680] ss:$0 sm:$0xff] }
 0xe75   :  { %3685 = vmatprep.subr.mxu0 %v2309_v36 }
 0xe76   :  { %3686 = vmatpush3.msra.mxu0 %v2309_v36 }
 0xe77   :  { %3687 = vmatprep.subr.mxu0 %v2308_v51 }
 0xe78   :  { %3688 = vmatpush3.msra.mxu0 %v2308_v51 }
 0xe79   :  { %3689 = vmatprep.subr.mxu0 %v2307_v52 }
 0xe7a   :  { %3690 = vmatpush3.msra.mxu0 %v2307_v52 }
 0xe7b   :  { %3691 = vmatprep.subr.mxu0 %v2306_v54 }
 0xe7c   :  { %3692 = vmatpush3.msra.mxu0 %v2306_v54 }
 0xf27   :  { %v3629_v59 = vpop.f32.mrf.mxu0 }
 0xf28   :  { %v2166_v37 = vadd.f32 %v3629_v59, %v2093_v58 }
 0xf29   :  { %v2160_v38 = vpop.f32.mrf.mxu0 }
 0xf2a   :  { %v2180_v60 = vmul.f32 0.01, %v2166_v37  ;;  %v2161_v62 = vadd.f32 %v2160_v38, %v2093_v58 }
 0xf2c   :  { %v2179_v48 = vmul.f32 0.01, %v2161_v62  ;;  %v2184_v63 = vmax.f32 %v2166_v37, %v2180_v60 }
 0xf2e   :  { %v2183_v42 = vmax.f32 %v2161_v62, %v2179_v48  ;;  %v3969_v4 = vadd.f32 %v2184_v63, %v3955_v46  ;;  %v2304_v46 = vld [vmem:[#allocation5 + $0x15b0] sm:$0xff] }
 0xf2f   :  { %v3632_v47 = vpop.f32.mrf.mxu0 }
 0xf30   :  { %v2176_v2 = vadd.f32 %v3632_v47, %v2093_v58  ;;  %v3966_v55 = vadd.f32 %v2183_v42, %v3953_v61  ;;  %v2305_v61 = vld [vmem:[#allocation5 + $0x15c0] sm:$0xff] }
 0xf31   :  { %v2170_v5 = vpop.f32.mrf.mxu0  ;;  %3693 = vmatprep.subr.mxu0 %v2305_v61 }
 0xf32   :  { %v2182_v6 = vmul.f32 0.01, %v2176_v2  ;;  %v2171_v7 = vadd.f32 %v2170_v5, %v2093_v58  ;;  %3665 = vmatprep.mubr.f32.mxu1 %v3966_v55  ;;  %3694 = vmatpush3.msra.mxu0 %v2305_v61 }
 0xf33   :  { %3666 = vmatmul.mubr.f32.vlgmr.msra.gmra.mxu1 %v3969_v4  ;;  %3695 = vmatprep.subr.mxu0 %v2304_v46 }
 0xf34   :  { %v2181_v8 = vmul.f32 0.01, %v2171_v7  ;;  %v2186_v56 = vmax.f32 %v2176_v2, %v2182_v6  ;;  %3696 = vmatpush3.msra.mxu0 %v2304_v46 }
 0xf35   :  { %3697 = vmatprep.subr.mxu0 %v2303_v1 }
 0xf36   :  { %v2185_v57 = vmax.f32 %v2171_v7, %v2181_v8  ;;  %v3977_v11 = vadd.f32 %v2186_v56, %v3961_v53  ;;  %3698 = vmatpush3.msra.mxu0 %v2303_v1  ;;  %v2430_v53 = vld [vmem:[#allocation5 + $0x1780] sm:$0xff] }
 0xf37   :  { %3699 = vmatprep.subr.mxu0 %v2302_v12  ;;  %3709 = vmatprep.subr.mxu1 %v2430_v53 }
 0xf38   :  { %v3974_v9 = vadd.f32 %v2185_v57, %v3959_v3  ;;  %3700 = vmatpush3.msra.mxu0 %v2302_v12  ;;  %v2301_v3 = vld [vmem:[#allocation5 + $0x1580] sm:$0xff]  ;;  %3710 = vmatpush3.msra.mxu1 %v2430_v53  ;;  %v2431_v57 = vld [vmem:[#allocation5 + $0x1790] ss:$0 sm:$0xff] }
 0xf39   :  { %3701 = vmatprep.subr.mxu0 %v2301_v3  ;;  %3711 = vmatprep.subr.mxu1 %v2429_v13 }
 0xf3a   :  { %3668 = vmatprep.mubr.f32.mxu1 %v3974_v9  ;;  %3702 = vmatpush3.msra.mxu0 %v2301_v3 }
 0xf3b   :  { %3669 = vmatmul.mubr.f32.gmra.mxu1 %v3977_v11 }
 0xf3c   :  { %3712 = vmatpush3.msra.mxu1 %v2429_v13 }
 0xf3d   :  { %3713 = vmatprep.subr.mxu1 %v2428_v14 }
 0xf3e   :  { %3714 = vmatpush3.msra.mxu1 %v2428_v14 }
 0xf3f   :  { %3715 = vmatprep.subr.mxu1 %v2427_v15 }
 0xf40   :  { %3716 = vmatpush3.msra.mxu1 %v2427_v15 }
 0xf41   :  { %3717 = vmatprep.subr.mxu1 %v2426_v20 }
 0xf42   :  { %3718 = vmatpush3.msra.mxu1 %v2426_v20 }
 0xf43   :  { %3719 = vmatprep.subr.mxu1 %v2425_v21 }
 0xf44   :  { %3720 = vmatpush3.msra.mxu1 %v2425_v21 }
 0xf45   :  { %3721 = vmatprep.subr.mxu1 %v2424_v22 }
 0xf46   :  { %3722 = vmatpush3.msra.mxu1 %v2424_v22 }
 0xf47   :  { %3723 = vmatprep.subr.mxu1 %v2423_v23 }
 0xf48   :  { %3724 = vmatpush3.msra.mxu1 %v2423_v23 }
 0xf49   :  { %3725 = vmatprep.subr.mxu1 %v2422_v24 }
 0xf4a   :  { %3726 = vmatpush3.msra.mxu1 %v2422_v24 }
 0xf4b   :  { %3727 = vmatprep.subr.mxu1 %v2421_v25 }
 0xf4c   :  { %3728 = vmatpush3.msra.mxu1 %v2421_v25 }
 0xf4d   :  { %3729 = vmatprep.subr.mxu1 %v2420_v29 }
 0xf4e   :  { %3730 = vmatpush3.msra.mxu1 %v2420_v29 }
 0xf4f   :  { %3731 = vmatprep.subr.mxu1 %v2419_v45 }
 0xf50   :  { %3732 = vmatpush3.msra.mxu1 %v2419_v45 }
 0xf51   :  { %3733 = vmatprep.subr.mxu1 %v2418_v27 }
 0xf52   :  { %3734 = vmatpush3.msra.mxu1 %v2418_v27 }
 0xf53   :  { %3735 = vmatprep.subr.mxu1 %v2417_v28 }
 0xf54   :  { %3736 = vmatpush3.msra.mxu1 %v2417_v28 }
 0xf55   :  { %3737 = vmatprep.subr.mxu1 %v2416_v49 }
 0xf56   :  { %3738 = vmatpush3.msra.mxu1 %v2416_v49 }
 0xf57   :  { %3739 = vmatprep.subr.mxu1 %v2415_v50 }
 0xf58   :  { %3740 = vmatpush3.msra.mxu1 %v2415_v50 }
 0xff3   :  { %v3667_v0 = vpop.f32.mrf.mxu1 }
 0xff4   :  { %v2280_v30 = vadd.f32 %v3667_v0, %v2207_v10 }
 0xff5   :  { %v2274_v31 = vpop.f32.mrf.mxu1 }
 0xff6   :  { %v2275_v16 = vadd.f32 %v2274_v31, %v2207_v10  ;;  %v2294_v17 = vmul.f32 0.01, %v2280_v30 }
 0xff8   :  { %v2293_v32 = vmul.f32 0.01, %v2275_v16  ;;  %v2298_v34 = vmax.f32 %v2280_v30, %v2294_v17 }
 0xffa   :  { %v2297_v33 = vmax.f32 %v2275_v16, %v2293_v32 }
 0xffb   :  { %v3670_v39 = vpop.f32.mrf.mxu1 }
 0xffc   :  { %v2290_v40 = vadd.f32 %v3670_v39, %v2207_v10  ;;  %3703 = vmatprep.mubr.f32.mxu0 %v2297_v33 }
 0xffd   :  { %v2284_v18 = vpop.f32.mrf.mxu1  ;;  %3704 = vmatmul.mubr.f32.vlgmr.msra.gmra.mxu0 %v2298_v34 }
 0xffe   :  { %v2285_v19 = vadd.f32 %v2284_v18, %v2207_v10  ;;  %v2296_v41 = vmul.f32 0.01, %v2290_v40 }
0x1000   :  { %v2295_v43 = vmul.f32 0.01, %v2285_v19  ;;  %v2300_v44 = vmax.f32 %v2290_v40, %v2296_v41 }
0x1002   :  { %v2299_v26 = vmax.f32 %v2285_v19, %v2295_v43 }
0x1004   :  { %3706 = vmatprep.mubr.f32.mxu0 %v2299_v26 }
0x1005   :  { %3707 = vmatmul.mubr.f32.gmra.mxu0 %v2300_v44 }
0x10bd   :  { %v3705_v36 = vpop.f32.mrf.mxu0 }
0x10be   :  { %v2390_v51 = vadd.f32 %v3705_v36, %v2317_v35 }
0x10bf   :  { %v2384_v52 = vpop.f32.mrf.mxu0 }
0x10c0   :  { %v2404_v54 = vmul.f32 0.01, %v2390_v51  ;;  %v2385_v58 = vadd.f32 %v2384_v52, %v2317_v35 }
0x10c2   :  { %v2403_v59 = vmul.f32 0.01, %v2385_v58  ;;  %v2408_v37 = vmax.f32 %v2390_v51, %v2404_v54 }
0x10c4   :  { %v2407_v38 = vmax.f32 %v2385_v58, %v2403_v59  ;;  %v2412_v63 = vadd.f32 %v2408_v37, %v3969_v4 }
0x10c5   :  { %v3708_v60 = vpop.f32.mrf.mxu0 }
0x10c6   :  { %v2400_v62 = vadd.f32 %v3708_v60, %v2317_v35  ;;  %v2411_v48 = vadd.f32 %v2407_v38, %v3966_v55 }
0x10c7   :  { %v2394_v42 = vpop.f32.mrf.mxu0 }
0x10c8   :  { %v2406_v47 = vmul.f32 0.01, %v2400_v62  ;;  %v2395_v2 = vadd.f32 %v2394_v42, %v2317_v35  ;;  %3741 = vmatprep.mubr.f32.mxu1 %v2411_v48 }
0x10c9   :  { %3742 = vmatmul.mubr.f32.vlgmr.msra.gmra.mxu1 %v2412_v63 }
0x10ca   :  { %v2405_v5 = vmul.f32 0.01, %v2395_v2  ;;  %v2410_v6 = vmax.f32 %v2400_v62, %v2406_v47 }
0x10cc   :  { %v2409_v7 = vmax.f32 %v2395_v2, %v2405_v5  ;;  %v2414_v56 = vadd.f32 %v2410_v6, %v3977_v11 }
0x10ce   :  { %v2413_v8 = vadd.f32 %v2409_v7, %v3974_v9 }
0x10d0   :  { %3744 = vmatprep.mubr.f32.mxu1 %v2413_v8 }
0x10d1   :  { %3745 = vmatmul.mubr.f32.gmra.mxu1 %v2414_v56 }
0x1189   :  { %v3743_v61 = vpop.f32.mrf.mxu1 }
0x118a   :  { %v2504_v46 = vadd.f32 %v3743_v61, %v2431_v57 }
0x118b   :  { %v2498_v55 = vpop.f32.mrf.mxu1 }
0x118c   :  { %2518 = vst [vmem:[#allocation7 + $0x8] sm:$0xff] %v2504_v46  ;;  %v2499_v4 = vadd.f32 %v2498_v55, %v2431_v57 }
0x118e   :  { %2517 = vst [vmem:[#allocation7] sm:$0xff] %v2499_v4 }
0x1191   :  { %v3746_v1 = vpop.f32.mrf.mxu1 }
0x1192   :  { %v2514_v12 = vadd.f32 %v3746_v1, %v2431_v57 }
0x1193   :  { %v2508_v3 = vpop.f32.mrf.mxu1 }
0x1194   :  { %2520 = vst [vmem:[#allocation7 + $0x18] sm:$0xff] %v2514_v12  ;;  %v2509_v53 = vadd.f32 %v2508_v3, %v2431_v57 }
0x1196   :  { %2519 = vst [vmem:[#allocation7 + $0x10] sm:$0xff] %v2509_v53 }
0x1197   :  { %3806 = shalt.err (!%p3803_p0)
}
0x1198   :  { %2532 = dma.vmem_to_hbm [thread:$0]  %s2527_s1, 512, %s3993_s2, [#allocation4], %s3822_s12, %s3822_s12, %s3823_s13  }
0x1199   :  { %3819 = dma.done.wait [#allocation4], 512  }
0x119a   :  { %3820 = vsyncadd [#allocation4], 4294966784 }
0x119b   :  { %2536 = vsyncpa [#allocation3], 1 }
0x119c   :  { %2537 = vsyncpa [#allocation6], 1 }
0x119d   :  { %2538 = vsyncpa [#allocation4], 1 }

</bundles_post_ra>
